<compile_context>
chip_gen: v7x
topology: tpu7x:2x2x1
jax: 0.10.0
libtpu: 0.0.40
codegen_flags: <defaults>
</compile_context>

<pallas_src>
import functools

import jax
import jax.numpy as jnp
from jax.experimental import pallas as pl
from jax.experimental.pallas import tpu as pltpu


def _lstm_chunk_kernel(x_ref, feat_ref, wih_ref, whh_ref, b_ref, h_out_ref,
                       h_sc, c_sc, *, matmul_dtype):
    # x_ref:     (Tc, Bp, E)
    # feat_ref:  (Bp, Hp)
    # wih_ref:   (E, 4*Hp)      fused gates [i | f | g | o]
    # whh_ref:   (Hp, 4*Hp)
    # b_ref:     (1, 4*Hp)
    # h_out_ref: (Tc, Bp, Hp)
    # h_sc/c_sc: (Bp, Hp) f32 scratch carried across grid steps

    @pl.when(pl.program_id(0) == 0)
    def _():
        f = feat_ref[...].astype(jnp.float32)
        h_sc[...] = f          # init_hidden: h0 = c0 = features
        c_sc[...] = f

    Tc = x_ref.shape[0]
    B, H = h_sc.shape          # padded batch / padded hidden

    w_ih = wih_ref[...].astype(matmul_dtype)                 # (E, 4H)
    w_hh = whh_ref[...].astype(matmul_dtype)                 # (H, 4H)
    bias = jnp.broadcast_to(b_ref[...], (B, 4 * H))          # hoisted: one broadcast per chunk

    def step(t, carry):
        h, c = carry                                          # f32 state
        x = x_ref[t].astype(matmul_dtype)                     # (B, E)
        pre = (jnp.dot(x, w_ih, preferred_element_type=jnp.float32)
               + jnp.dot(h.astype(matmul_dtype), w_hh,
                         preferred_element_type=jnp.float32)
               + bias)                                        # (B, 4H), one fused MXU pair
        i_g = jax.nn.sigmoid(pre[:, 0 * H:1 * H])
        f_g = jax.nn.sigmoid(pre[:, 1 * H:2 * H])
        g_g = jnp.tanh(pre[:, 2 * H:3 * H])
        o_g = jax.nn.sigmoid(pre[:, 3 * H:4 * H])
        c_new = f_g * c + i_g * g_g
        h_new = o_g * jnp.tanh(c_new)
        h_out_ref[t] = h_new.astype(h_out_ref.dtype)
        return h_new, c_new

    h_fin, c_fin = jax.lax.fori_loop(0, Tc, step,
                                     (h_sc[...], c_sc[...]), unroll=True)
    h_sc[...] = h_fin
    c_sc[...] = c_fin


def decoder_rnn_forward(params, features, captions, *, chunk=8,
                        matmul_dtype=jnp.float32):
    """Pallas implementation of DecoderRNN.forward.

    features: (B, H) float32, captions: (B, T) int32.
    Returns (B, T, V) float32 with outputs[:, 0, :] == 0 (same as the torch module).
    Set matmul_dtype=jnp.bfloat16 on v6e/v7x for bf16 MXU operands (f32 accumulation/state).
    """
    B, T = captions.shape
    E = params["embed"].shape[1]
    H = params["w_fc"].shape[0]
    V = params["w_fc"].shape[1]

    if T < 2:                                  # guard: empty time loop
        return jnp.zeros((B, T, V), jnp.float32)

    Tm = T - 1
    # ---- glue: embedding gather, time-major layout ----------------------------------
    emb = jnp.take(params["embed"], captions[:, :Tm], axis=0)   # (B, Tm, E)
    x_tm = jnp.transpose(emb, (1, 0, 2))                        # (Tm, B, E)

    # ---- pad to hardware tiles (exact: padded weights/state are zero) ----------------
    Bp = ((B + 7) // 8) * 8            # sublane multiple
    Hp = ((H + 127) // 128) * 128      # lane multiple (gates are 4*Hp lanes wide)
    Tc = min(chunk, Tm)                # timesteps per grid step
    Tp = pl.cdiv(Tm, Tc) * Tc

    x_pad = jnp.zeros((Tp, Bp, E), jnp.float32).at[:Tm, :B, :].set(
        x_tm.astype(jnp.float32))
    feat_pad = jnp.zeros((Bp, Hp), jnp.float32).at[:B, :H].set(
        features.astype(jnp.float32))

    # fused + zero-padded gate weights: (E, 4Hp), (Hp, 4Hp), (1, 4Hp); gate order i,f,g,o
    w_ih4 = jnp.zeros((E, 4 * Hp), jnp.float32)
    w_hh4 = jnp.zeros((Hp, 4 * Hp), jnp.float32)
    b4 = jnp.zeros((1, 4 * Hp), jnp.float32)
    for k in range(4):
        w_ih4 = w_ih4.at[:, k * Hp:k * Hp + H].set(params["w_ih"][k])
        w_hh4 = w_hh4.at[:H, k * Hp:k * Hp + H].set(params["w_hh"][k])
        b4 = b4.at[0, k * Hp:k * Hp + H].set(params["b"][k])

    grid = (Tp // Tc,)
    kernel = functools.partial(_lstm_chunk_kernel, matmul_dtype=matmul_dtype)

    h_tm = pl.pallas_call(
        kernel,
        out_shape=jax.ShapeDtypeStruct((Tp, Bp, Hp), jnp.float32),
        grid_spec=pltpu.PrefetchScalarGridSpec(
            num_scalar_prefetch=0,
            grid=grid,
            in_specs=[
                pl.BlockSpec((Tc, Bp, E), lambda g: (g, 0, 0)),        # x chunk at grid step g
                pl.BlockSpec((Bp, Hp), lambda g: (0, 0)),              # features (constant)
                pl.BlockSpec((E, 4 * Hp), lambda g: (0, 0)),           # W_ih fused (constant)
                pl.BlockSpec((Hp, 4 * Hp), lambda g: (0, 0)),          # W_hh fused (constant)
                pl.BlockSpec((1, 4 * Hp), lambda g: (0, 0)),           # bias fused (constant)
            ],
            out_specs=pl.BlockSpec((Tc, Bp, Hp), lambda g: (g, 0, 0)),
            scratch_shapes=[
                pltpu.VMEM((Bp, Hp), jnp.float32),   # hidden state (persists across grid)
                pltpu.VMEM((Bp, Hp), jnp.float32),   # cell state
            ],
        ),
        compiler_params=pltpu.CompilerParams(
            dimension_semantics=("arbitrary",),      # sequential time recurrence
        ),
    )(x_pad, feat_pad, w_ih4, w_hh4, b4)

    # ---- hoisted, time-batched FC projection (no recurrence; one big MXU matmul) -----
    h_valid = h_tm[:Tm, :B, :H]                                   # (Tm, B, H)
    logits = jnp.einsum("tbh,hv->tbv", h_valid, params["w_fc"]) + params["b_fc"]
    out = jnp.transpose(logits, (1, 0, 2))                        # (B, Tm, V)
    zeros0 = jnp.zeros((B, 1, V), jnp.float32)
    return jnp.concatenate([zeros0, out], axis=1)                 # (B, T, V)


def reference_forward(params, features, captions):
    """Pure-JAX reference matching the torch semantics."""
    B, T = captions.shape
    V = params["w_fc"].shape[1]
    emb = params["embed"][captions]
    h = features.astype(jnp.float32)
    c = features.astype(jnp.float32)
    outs = [jnp.zeros((B, V), jnp.float32)]
    for t in range(T - 1):
        x = emb[:, t, :]
        gates = [x @ params["w_ih"][k] + h @ params["w_hh"][k] + params["b"][k]
                 for k in range(4)]
        i_g = jax.nn.sigmoid(gates[0])
        f_g = jax.nn.sigmoid(gates[1])
        g_g = jnp.tanh(gates[2])
        o_g = jax.nn.sigmoid(gates[3])
        c = f_g * c + i_g * g_g
        h = o_g * jnp.tanh(c)
        outs.append(h @ params["w_fc"] + params["b_fc"])
    return jnp.stack(outs, axis=1)


def init_params(key, embed_size, hidden_size, vocab_size):
    ks = jax.random.split(key, 6)
    s = 0.1
    return {
        "embed": s * jax.random.normal(ks[0], (vocab_size, embed_size), jnp.float32),
        # gate order i, f, g, o; stored pre-transposed as (in_dim, H) per gate
        "w_ih": s * jax.random.normal(ks[1], (4, embed_size, hidden_size), jnp.float32),
        "w_hh": s * jax.random.normal(ks[2], (4, hidden_size, hidden_size), jnp.float32),
        "b":    s * jax.random.normal(ks[3], (4, hidden_size), jnp.float32),   # b_ih + b_hh
        "w_fc": s * jax.random.normal(ks[4], (hidden_size, vocab_size), jnp.float32),
        "b_fc": s * jax.random.normal(ks[5], (vocab_size,), jnp.float32),
    }


# TODO(synk): DecoderRNN.sample() (host-side top-k stochastic decoding with numpy) is not ported.

if __name__ == "__main__":
    key = jax.random.PRNGKey(0)
    B, T = 2, 8
    embed_size, hidden_size, vocab_size = 32, 32, 128

    kp, kf, kc = jax.random.split(key, 3)
    params = init_params(kp, embed_size, hidden_size, vocab_size)
    features = jax.random.normal(kf, (B, hidden_size), jnp.float32)
    captions = jax.random.randint(kc, (B, T), 0, vocab_size, dtype=jnp.int32)

    out = jax.jit(decoder_rnn_forward)(params, features, captions)
    out = jax.block_until_ready(out)

    ref = reference_forward(params, features, captions)
    assert out.shape == (B, T, vocab_size)
    assert jnp.allclose(out[:, 0, :], 0.0)
    assert jnp.allclose(out, ref, rtol=1e-3, atol=1e-3), "mismatch vs reference"

    print("KERNEL_OK")
</pallas_src>

<mosaic_0001>
module attributes {stable_mosaic.version = 11 : i64} {
  func.func @_lstm_chunk_kernel(%arg0: i32, %arg1: memref<7x8x32xf32, #tpu.memory_space<vmem>>, %arg2: memref<8x128xf32, #tpu.memory_space<vmem>>, %arg3: memref<32x512xf32, #tpu.memory_space<vmem>>, %arg4: memref<128x512xf32, #tpu.memory_space<vmem>>, %arg5: memref<1x512xf32, #tpu.memory_space<vmem>>, %arg6: memref<7x8x128xf32, #tpu.memory_space<vmem>>, %arg7: memref<8x128xf32, #tpu.memory_space<vmem>>, %arg8: memref<8x128xf32, #tpu.memory_space<vmem>>) attributes {dimension_semantics = [#tpu.dimension_semantics<arbitrary>], iteration_bounds = array<i64: 1>, scalar_prefetch = 0 : i64, scratch_operands = 2 : i64, tpu.core_type = #tpu.core_type<tc>, window_params = [{transform_indices = @transform_0, window_bounds = array<i64: 7, 8, 32>}, {pipeline_mode = #tpu.pipeline_mode<synchronous>, transform_indices = @transform_1, window_bounds = array<i64: 8, 128>}, {pipeline_mode = #tpu.pipeline_mode<synchronous>, transform_indices = @transform_2, window_bounds = array<i64: 32, 512>}, {pipeline_mode = #tpu.pipeline_mode<synchronous>, transform_indices = @transform_3, window_bounds = array<i64: 128, 512>}, {pipeline_mode = #tpu.pipeline_mode<synchronous>, transform_indices = @transform_4, window_bounds = array<i64: 1, 512>}, {transform_indices = @transform_5, window_bounds = array<i64: 7, 8, 128>}]} {
    %c0_i32 = arith.constant 0 : i32
    %0 = arith.cmpi eq, %arg0, %c0_i32 : i32
    %1 = arith.extui %0 : i1 to i32
    %c0_i32_0 = arith.constant 0 : i32
    %2 = arith.cmpi ne, %1, %c0_i32_0 : i32
    scf.if %2 {
      %c0_77 = arith.constant 0 : index
      %c0_78 = arith.constant 0 : index
      %264 = vector.load %arg2[%c0_77, %c0_78] : memref<8x128xf32, #tpu.memory_space<vmem>>, vector<8x128xf32>
      %c0_79 = arith.constant 0 : index
      %c0_80 = arith.constant 0 : index
      %265 = vector.load %arg7[%c0_79, %c0_80] : memref<8x128xf32, #tpu.memory_space<vmem>>, vector<8x128xf32>
      tpu.vector_store %arg7[%c0_79, %c0_80], %264 {strides = array<i32>} : memref<8x128xf32, #tpu.memory_space<vmem>>, vector<8x128xf32>,
      %c0_81 = arith.constant 0 : index
      %c0_82 = arith.constant 0 : index
      %266 = vector.load %arg8[%c0_81, %c0_82] : memref<8x128xf32, #tpu.memory_space<vmem>>, vector<8x128xf32>
      tpu.vector_store %arg8[%c0_81, %c0_82], %264 {strides = array<i32>} : memref<8x128xf32, #tpu.memory_space<vmem>>, vector<8x128xf32>,
    } else {
    }
    %c0 = arith.constant 0 : index
    %c0_1 = arith.constant 0 : index
    %3 = vector.load %arg3[%c0, %c0_1] : memref<32x512xf32, #tpu.memory_space<vmem>>, vector<32x512xf32>
    %c0_2 = arith.constant 0 : index
    %c0_3 = arith.constant 0 : index
    %4 = vector.load %arg4[%c0_2, %c0_3] : memref<128x512xf32, #tpu.memory_space<vmem>>, vector<128x512xf32>
    %c0_4 = arith.constant 0 : index
    %c0_5 = arith.constant 0 : index
    %5 = vector.load %arg5[%c0_4, %c0_5] : memref<1x512xf32, #tpu.memory_space<vmem>>, vector<1x512xf32>
    %6 = vector.shape_cast %5 : vector<1x512xf32> to vector<1x512xf32>
    %7 = vector.broadcast %6 : vector<1x512xf32> to vector<8x512xf32>
    %c0_6 = arith.constant 0 : index
    %c0_7 = arith.constant 0 : index
    %8 = vector.load %arg7[%c0_6, %c0_7] : memref<8x128xf32, #tpu.memory_space<vmem>>, vector<8x128xf32>
    %c0_8 = arith.constant 0 : index
    %c0_9 = arith.constant 0 : index
    %9 = vector.load %arg8[%c0_8, %c0_9] : memref<8x128xf32, #tpu.memory_space<vmem>>, vector<8x128xf32>
    %c0_i32_10 = arith.constant 0 : i32
    %10 = arith.index_cast %c0_i32_10 : i32 to index
    %c0_11 = arith.constant 0 : index
    %c0_12 = arith.constant 0 : index
    %11 = vector.load %arg1[%10, %c0_11, %c0_12] : memref<7x8x32xf32, #tpu.memory_space<vmem>>, vector<1x8x32xf32>
    %12 = vector.shape_cast %11 : vector<1x8x32xf32> to vector<8x32xf32>
    %cst = arith.constant dense<0.000000e+00> : vector<8x512xf32>
    %13 = tpu.matmul %12, %3, %cst {dimension_numbers = #tpu.dot_dimension_numbers<[1], [0], [0], [1], [0, 0, 1, 1], [], []>} : vector<8x32xf32>, vector<32x512xf32>, vector<8x512xf32> -> vector<8x512xf32>
    %cst_13 = arith.constant dense<0.000000e+00> : vector<8x512xf32>
    %14 = tpu.matmul %8, %4, %cst_13 {dimension_numbers = #tpu.dot_dimension_numbers<[1], [0], [0], [1], [0, 0, 1, 1], [], []>} : vector<8x128xf32>, vector<128x512xf32>, vector<8x512xf32> -> vector<8x512xf32>
    %15 = arith.addf %13, %14 : vector<8x512xf32>
    %16 = arith.addf %15, %7 : vector<8x512xf32>
    %17 = vector.extract_strided_slice %16 {offsets = [0, 0], sizes = [8, 128], strides = [1, 1]} : vector<8x512xf32> to vector<8x128xf32>
    %18 = arith.negf %17 : vector<8x128xf32>
    %19 = math.exp %18 : vector<8x128xf32>
    %cst_14 = arith.constant 1.000000e+00 : f32
    %20 = vector.broadcast %cst_14 : f32 to vector<8x128xf32>
    %21 = arith.addf %20, %19 : vector<8x128xf32>
    %22 = arith.divf %20, %21 : vector<8x128xf32>
    %23 = vector.extract_strided_slice %16 {offsets = [0, 128], sizes = [8, 128], strides = [1, 1]} : vector<8x512xf32> to vector<8x128xf32>
    %24 = arith.negf %23 : vector<8x128xf32>
    %25 = math.exp %24 : vector<8x128xf32>
    %cst_15 = arith.constant 1.000000e+00 : f32
    %26 = vector.broadcast %cst_15 : f32 to vector<8x128xf32>
    %27 = arith.addf %26, %25 : vector<8x128xf32>
    %28 = arith.divf %26, %27 : vector<8x128xf32>
    %29 = vector.extract_strided_slice %16 {offsets = [0, 256], sizes = [8, 128], strides = [1, 1]} : vector<8x512xf32> to vector<8x128xf32>
    %30 = math.tanh %29 : vector<8x128xf32>
    %31 = vector.extract_strided_slice %16 {offsets = [0, 384], sizes = [8, 128], strides = [1, 1]} : vector<8x512xf32> to vector<8x128xf32>
    %32 = arith.negf %31 : vector<8x128xf32>
    %33 = math.exp %32 : vector<8x128xf32>
    %cst_16 = arith.constant 1.000000e+00 : f32
    %34 = vector.broadcast %cst_16 : f32 to vector<8x128xf32>
    %35 = arith.addf %34, %33 : vector<8x128xf32>
    %36 = arith.divf %34, %35 : vector<8x128xf32>
    %37 = arith.mulf %28, %9 : vector<8x128xf32>
    %38 = arith.mulf %22, %30 : vector<8x128xf32>
    %39 = arith.addf %37, %38 : vector<8x128xf32>
    %40 = math.tanh %39 : vector<8x128xf32>
    %41 = arith.mulf %36, %40 : vector<8x128xf32>
    %42 = arith.index_cast %c0_i32_10 : i32 to index
    %c0_17 = arith.constant 0 : index
    %c0_18 = arith.constant 0 : index
    %43 = vector.load %arg6[%42, %c0_17, %c0_18] : memref<7x8x128xf32, #tpu.memory_space<vmem>>, vector<1x8x128xf32>
    %44 = vector.shape_cast %43 : vector<1x8x128xf32> to vector<8x128xf32>
    %45 = vector.shape_cast %41 : vector<8x128xf32> to vector<1x8x128xf32>
    tpu.vector_store %arg6[%42, %c0_17, %c0_18], %45 {strides = array<i32>} : memref<7x8x128xf32, #tpu.memory_space<vmem>>, vector<1x8x128xf32>,
    %c1_i32 = arith.constant 1 : i32
    %46 = arith.index_cast %c1_i32 : i32 to index
    %c0_19 = arith.constant 0 : index
    %c0_20 = arith.constant 0 : index
    %47 = vector.load %arg1[%46, %c0_19, %c0_20] : memref<7x8x32xf32, #tpu.memory_space<vmem>>, vector<1x8x32xf32>
    %48 = vector.shape_cast %47 : vector<1x8x32xf32> to vector<8x32xf32>
    %cst_21 = arith.constant dense<0.000000e+00> : vector<8x512xf32>
    %49 = tpu.matmul %48, %3, %cst_21 {dimension_numbers = #tpu.dot_dimension_numbers<[1], [0], [0], [1], [0, 0, 1, 1], [], []>} : vector<8x32xf32>, vector<32x512xf32>, vector<8x512xf32> -> vector<8x512xf32>
    %cst_22 = arith.constant dense<0.000000e+00> : vector<8x512xf32>
    %50 = tpu.matmul %41, %4, %cst_22 {dimension_numbers = #tpu.dot_dimension_numbers<[1], [0], [0], [1], [0, 0, 1, 1], [], []>} : vector<8x128xf32>, vector<128x512xf32>, vector<8x512xf32> -> vector<8x512xf32>
    %51 = arith.addf %49, %50 : vector<8x512xf32>
    %52 = arith.addf %51, %7 : vector<8x512xf32>
    %53 = vector.extract_strided_slice %52 {offsets = [0, 0], sizes = [8, 128], strides = [1, 1]} : vector<8x512xf32> to vector<8x128xf32>
    %54 = arith.negf %53 : vector<8x128xf32>
    %55 = math.exp %54 : vector<8x128xf32>
    %cst_23 = arith.constant 1.000000e+00 : f32
    %56 = vector.broadcast %cst_23 : f32 to vector<8x128xf32>
    %57 = arith.addf %56, %55 : vector<8x128xf32>
    %58 = arith.divf %56, %57 : vector<8x128xf32>
    %59 = vector.extract_strided_slice %52 {offsets = [0, 128], sizes = [8, 128], strides = [1, 1]} : vector<8x512xf32> to vector<8x128xf32>
    %60 = arith.negf %59 : vector<8x128xf32>
    %61 = math.exp %60 : vector<8x128xf32>
    %cst_24 = arith.constant 1.000000e+00 : f32
    %62 = vector.broadcast %cst_24 : f32 to vector<8x128xf32>
    %63 = arith.addf %62, %61 : vector<8x128xf32>
    %64 = arith.divf %62, %63 : vector<8x128xf32>
    %65 = vector.extract_strided_slice %52 {offsets = [0, 256], sizes = [8, 128], strides = [1, 1]} : vector<8x512xf32> to vector<8x128xf32>
    %66 = math.tanh %65 : vector<8x128xf32>
    %67 = vector.extract_strided_slice %52 {offsets = [0, 384], sizes = [8, 128], strides = [1, 1]} : vector<8x512xf32> to vector<8x128xf32>
    %68 = arith.negf %67 : vector<8x128xf32>
    %69 = math.exp %68 : vector<8x128xf32>
    %cst_25 = arith.constant 1.000000e+00 : f32
    %70 = vector.broadcast %cst_25 : f32 to vector<8x128xf32>
    %71 = arith.addf %70, %69 : vector<8x128xf32>
    %72 = arith.divf %70, %71 : vector<8x128xf32>
    %73 = arith.mulf %64, %39 : vector<8x128xf32>
    %74 = arith.mulf %58, %66 : vector<8x128xf32>
    %75 = arith.addf %73, %74 : vector<8x128xf32>
    %76 = math.tanh %75 : vector<8x128xf32>
    %77 = arith.mulf %72, %76 : vector<8x128xf32>
    %78 = arith.index_cast %c1_i32 : i32 to index
    %c0_26 = arith.constant 0 : index
    %c0_27 = arith.constant 0 : index
    %79 = vector.load %arg6[%78, %c0_26, %c0_27] : memref<7x8x128xf32, #tpu.memory_space<vmem>>, vector<1x8x128xf32>
    %80 = vector.shape_cast %79 : vector<1x8x128xf32> to vector<8x128xf32>
    %81 = vector.shape_cast %77 : vector<8x128xf32> to vector<1x8x128xf32>
    tpu.vector_store %arg6[%78, %c0_26, %c0_27], %81 {strides = array<i32>} : memref<7x8x128xf32, #tpu.memory_space<vmem>>, vector<1x8x128xf32>,
    %c2_i32 = arith.constant 2 : i32
    %82 = arith.index_cast %c2_i32 : i32 to index
    %c0_28 = arith.constant 0 : index
    %c0_29 = arith.constant 0 : index
    %83 = vector.load %arg1[%82, %c0_28, %c0_29] : memref<7x8x32xf32, #tpu.memory_space<vmem>>, vector<1x8x32xf32>
    %84 = vector.shape_cast %83 : vector<1x8x32xf32> to vector<8x32xf32>
    %cst_30 = arith.constant dense<0.000000e+00> : vector<8x512xf32>
    %85 = tpu.matmul %84, %3, %cst_30 {dimension_numbers = #tpu.dot_dimension_numbers<[1], [0], [0], [1], [0, 0, 1, 1], [], []>} : vector<8x32xf32>, vector<32x512xf32>, vector<8x512xf32> -> vector<8x512xf32>
    %cst_31 = arith.constant dense<0.000000e+00> : vector<8x512xf32>
    %86 = tpu.matmul %77, %4, %cst_31 {dimension_numbers = #tpu.dot_dimension_numbers<[1], [0], [0], [1], [0, 0, 1, 1], [], []>} : vector<8x128xf32>, vector<128x512xf32>, vector<8x512xf32> -> vector<8x512xf32>
    %87 = arith.addf %85, %86 : vector<8x512xf32>
    %88 = arith.addf %87, %7 : vector<8x512xf32>
    %89 = vector.extract_strided_slice %88 {offsets = [0, 0], sizes = [8, 128], strides = [1, 1]} : vector<8x512xf32> to vector<8x128xf32>
    %90 = arith.negf %89 : vector<8x128xf32>
    %91 = math.exp %90 : vector<8x128xf32>
    %cst_32 = arith.constant 1.000000e+00 : f32
    %92 = vector.broadcast %cst_32 : f32 to vector<8x128xf32>
    %93 = arith.addf %92, %91 : vector<8x128xf32>
    %94 = arith.divf %92, %93 : vector<8x128xf32>
    %95 = vector.extract_strided_slice %88 {offsets = [0, 128], sizes = [8, 128], strides = [1, 1]} : vector<8x512xf32> to vector<8x128xf32>
    %96 = arith.negf %95 : vector<8x128xf32>
    %97 = math.exp %96 : vector<8x128xf32>
    %cst_33 = arith.constant 1.000000e+00 : f32
    %98 = vector.broadcast %cst_33 : f32 to vector<8x128xf32>
    %99 = arith.addf %98, %97 : vector<8x128xf32>
    %100 = arith.divf %98, %99 : vector<8x128xf32>
    %101 = vector.extract_strided_slice %88 {offsets = [0, 256], sizes = [8, 128], strides = [1, 1]} : vector<8x512xf32> to vector<8x128xf32>
    %102 = math.tanh %101 : vector<8x128xf32>
    %103 = vector.extract_strided_slice %88 {offsets = [0, 384], sizes = [8, 128], strides = [1, 1]} : vector<8x512xf32> to vector<8x128xf32>
    %104 = arith.negf %103 : vector<8x128xf32>
    %105 = math.exp %104 : vector<8x128xf32>
    %cst_34 = arith.constant 1.000000e+00 : f32
    %106 = vector.broadcast %cst_34 : f32 to vector<8x128xf32>
    %107 = arith.addf %106, %105 : vector<8x128xf32>
    %108 = arith.divf %106, %107 : vector<8x128xf32>
    %109 = arith.mulf %100, %75 : vector<8x128xf32>
    %110 = arith.mulf %94, %102 : vector<8x128xf32>
    %111 = arith.addf %109, %110 : vector<8x128xf32>
    %112 = math.tanh %111 : vector<8x128xf32>
    %113 = arith.mulf %108, %112 : vector<8x128xf32>
    %114 = arith.index_cast %c2_i32 : i32 to index
    %c0_35 = arith.constant 0 : index
    %c0_36 = arith.constant 0 : index
    %115 = vector.load %arg6[%114, %c0_35, %c0_36] : memref<7x8x128xf32, #tpu.memory_space<vmem>>, vector<1x8x128xf32>
    %116 = vector.shape_cast %115 : vector<1x8x128xf32> to vector<8x128xf32>
    %117 = vector.shape_cast %113 : vector<8x128xf32> to vector<1x8x128xf32>
    tpu.vector_store %arg6[%114, %c0_35, %c0_36], %117 {strides = array<i32>} : memref<7x8x128xf32, #tpu.memory_space<vmem>>, vector<1x8x128xf32>,
    %c3_i32 = arith.constant 3 : i32
    %118 = arith.index_cast %c3_i32 : i32 to index
    %c0_37 = arith.constant 0 : index
    %c0_38 = arith.constant 0 : index
    %119 = vector.load %arg1[%118, %c0_37, %c0_38] : memref<7x8x32xf32, #tpu.memory_space<vmem>>, vector<1x8x32xf32>
    %120 = vector.shape_cast %119 : vector<1x8x32xf32> to vector<8x32xf32>
    %cst_39 = arith.constant dense<0.000000e+00> : vector<8x512xf32>
    %121 = tpu.matmul %120, %3, %cst_39 {dimension_numbers = #tpu.dot_dimension_numbers<[1], [0], [0], [1], [0, 0, 1, 1], [], []>} : vector<8x32xf32>, vector<32x512xf32>, vector<8x512xf32> -> vector<8x512xf32>
    %cst_40 = arith.constant dense<0.000000e+00> : vector<8x512xf32>
    %122 = tpu.matmul %113, %4, %cst_40 {dimension_numbers = #tpu.dot_dimension_numbers<[1], [0], [0], [1], [0, 0, 1, 1], [], []>} : vector<8x128xf32>, vector<128x512xf32>, vector<8x512xf32> -> vector<8x512xf32>
    %123 = arith.addf %121, %122 : vector<8x512xf32>
    %124 = arith.addf %123, %7 : vector<8x512xf32>
    %125 = vector.extract_strided_slice %124 {offsets = [0, 0], sizes = [8, 128], strides = [1, 1]} : vector<8x512xf32> to vector<8x128xf32>
    %126 = arith.negf %125 : vector<8x128xf32>
    %127 = math.exp %126 : vector<8x128xf32>
    %cst_41 = arith.constant 1.000000e+00 : f32
    %128 = vector.broadcast %cst_41 : f32 to vector<8x128xf32>
    %129 = arith.addf %128, %127 : vector<8x128xf32>
    %130 = arith.divf %128, %129 : vector<8x128xf32>
    %131 = vector.extract_strided_slice %124 {offsets = [0, 128], sizes = [8, 128], strides = [1, 1]} : vector<8x512xf32> to vector<8x128xf32>
    %132 = arith.negf %131 : vector<8x128xf32>
    %133 = math.exp %132 : vector<8x128xf32>
    %cst_42 = arith.constant 1.000000e+00 : f32
    %134 = vector.broadcast %cst_42 : f32 to vector<8x128xf32>
    %135 = arith.addf %134, %133 : vector<8x128xf32>
    %136 = arith.divf %134, %135 : vector<8x128xf32>
    %137 = vector.extract_strided_slice %124 {offsets = [0, 256], sizes = [8, 128], strides = [1, 1]} : vector<8x512xf32> to vector<8x128xf32>
    %138 = math.tanh %137 : vector<8x128xf32>
    %139 = vector.extract_strided_slice %124 {offsets = [0, 384], sizes = [8, 128], strides = [1, 1]} : vector<8x512xf32> to vector<8x128xf32>
    %140 = arith.negf %139 : vector<8x128xf32>
    %141 = math.exp %140 : vector<8x128xf32>
    %cst_43 = arith.constant 1.000000e+00 : f32
    %142 = vector.broadcast %cst_43 : f32 to vector<8x128xf32>
    %143 = arith.addf %142, %141 : vector<8x128xf32>
    %144 = arith.divf %142, %143 : vector<8x128xf32>
    %145 = arith.mulf %136, %111 : vector<8x128xf32>
    %146 = arith.mulf %130, %138 : vector<8x128xf32>
    %147 = arith.addf %145, %146 : vector<8x128xf32>
    %148 = math.tanh %147 : vector<8x128xf32>
    %149 = arith.mulf %144, %148 : vector<8x128xf32>
    %150 = arith.index_cast %c3_i32 : i32 to index
    %c0_44 = arith.constant 0 : index
    %c0_45 = arith.constant 0 : index
    %151 = vector.load %arg6[%150, %c0_44, %c0_45] : memref<7x8x128xf32, #tpu.memory_space<vmem>>, vector<1x8x128xf32>
    %152 = vector.shape_cast %151 : vector<1x8x128xf32> to vector<8x128xf32>
    %153 = vector.shape_cast %149 : vector<8x128xf32> to vector<1x8x128xf32>
    tpu.vector_store %arg6[%150, %c0_44, %c0_45], %153 {strides = array<i32>} : memref<7x8x128xf32, #tpu.memory_space<vmem>>, vector<1x8x128xf32>,
    %c4_i32 = arith.constant 4 : i32
    %154 = arith.index_cast %c4_i32 : i32 to index
    %c0_46 = arith.constant 0 : index
    %c0_47 = arith.constant 0 : index
    %155 = vector.load %arg1[%154, %c0_46, %c0_47] : memref<7x8x32xf32, #tpu.memory_space<vmem>>, vector<1x8x32xf32>
    %156 = vector.shape_cast %155 : vector<1x8x32xf32> to vector<8x32xf32>
    %cst_48 = arith.constant dense<0.000000e+00> : vector<8x512xf32>
    %157 = tpu.matmul %156, %3, %cst_48 {dimension_numbers = #tpu.dot_dimension_numbers<[1], [0], [0], [1], [0, 0, 1, 1], [], []>} : vector<8x32xf32>, vector<32x512xf32>, vector<8x512xf32> -> vector<8x512xf32>
    %cst_49 = arith.constant dense<0.000000e+00> : vector<8x512xf32>
    %158 = tpu.matmul %149, %4, %cst_49 {dimension_numbers = #tpu.dot_dimension_numbers<[1], [0], [0], [1], [0, 0, 1, 1], [], []>} : vector<8x128xf32>, vector<128x512xf32>, vector<8x512xf32> -> vector<8x512xf32>
    %159 = arith.addf %157, %158 : vector<8x512xf32>
    %160 = arith.addf %159, %7 : vector<8x512xf32>
    %161 = vector.extract_strided_slice %160 {offsets = [0, 0], sizes = [8, 128], strides = [1, 1]} : vector<8x512xf32> to vector<8x128xf32>
    %162 = arith.negf %161 : vector<8x128xf32>
    %163 = math.exp %162 : vector<8x128xf32>
    %cst_50 = arith.constant 1.000000e+00 : f32
    %164 = vector.broadcast %cst_50 : f32 to vector<8x128xf32>
    %165 = arith.addf %164, %163 : vector<8x128xf32>
    %166 = arith.divf %164, %165 : vector<8x128xf32>
    %167 = vector.extract_strided_slice %160 {offsets = [0, 128], sizes = [8, 128], strides = [1, 1]} : vector<8x512xf32> to vector<8x128xf32>
    %168 = arith.negf %167 : vector<8x128xf32>
    %169 = math.exp %168 : vector<8x128xf32>
    %cst_51 = arith.constant 1.000000e+00 : f32
    %170 = vector.broadcast %cst_51 : f32 to vector<8x128xf32>
    %171 = arith.addf %170, %169 : vector<8x128xf32>
    %172 = arith.divf %170, %171 : vector<8x128xf32>
    %173 = vector.extract_strided_slice %160 {offsets = [0, 256], sizes = [8, 128], strides = [1, 1]} : vector<8x512xf32> to vector<8x128xf32>
    %174 = math.tanh %173 : vector<8x128xf32>
    %175 = vector.extract_strided_slice %160 {offsets = [0, 384], sizes = [8, 128], strides = [1, 1]} : vector<8x512xf32> to vector<8x128xf32>
    %176 = arith.negf %175 : vector<8x128xf32>
    %177 = math.exp %176 : vector<8x128xf32>
    %cst_52 = arith.constant 1.000000e+00 : f32
    %178 = vector.broadcast %cst_52 : f32 to vector<8x128xf32>
    %179 = arith.addf %178, %177 : vector<8x128xf32>
    %180 = arith.divf %178, %179 : vector<8x128xf32>
    %181 = arith.mulf %172, %147 : vector<8x128xf32>
    %182 = arith.mulf %166, %174 : vector<8x128xf32>
    %183 = arith.addf %181, %182 : vector<8x128xf32>
    %184 = math.tanh %183 : vector<8x128xf32>
    %185 = arith.mulf %180, %184 : vector<8x128xf32>
    %186 = arith.index_cast %c4_i32 : i32 to index
    %c0_53 = arith.constant 0 : index
    %c0_54 = arith.constant 0 : index
    %187 = vector.load %arg6[%186, %c0_53, %c0_54] : memref<7x8x128xf32, #tpu.memory_space<vmem>>, vector<1x8x128xf32>
    %188 = vector.shape_cast %187 : vector<1x8x128xf32> to vector<8x128xf32>
    %189 = vector.shape_cast %185 : vector<8x128xf32> to vector<1x8x128xf32>
    tpu.vector_store %arg6[%186, %c0_53, %c0_54], %189 {strides = array<i32>} : memref<7x8x128xf32, #tpu.memory_space<vmem>>, vector<1x8x128xf32>,
    %c5_i32 = arith.constant 5 : i32
    %190 = arith.index_cast %c5_i32 : i32 to index
    %c0_55 = arith.constant 0 : index
    %c0_56 = arith.constant 0 : index
    %191 = vector.load %arg1[%190, %c0_55, %c0_56] : memref<7x8x32xf32, #tpu.memory_space<vmem>>, vector<1x8x32xf32>
    %192 = vector.shape_cast %191 : vector<1x8x32xf32> to vector<8x32xf32>
    %cst_57 = arith.constant dense<0.000000e+00> : vector<8x512xf32>
    %193 = tpu.matmul %192, %3, %cst_57 {dimension_numbers = #tpu.dot_dimension_numbers<[1], [0], [0], [1], [0, 0, 1, 1], [], []>} : vector<8x32xf32>, vector<32x512xf32>, vector<8x512xf32> -> vector<8x512xf32>
    %cst_58 = arith.constant dense<0.000000e+00> : vector<8x512xf32>
    %194 = tpu.matmul %185, %4, %cst_58 {dimension_numbers = #tpu.dot_dimension_numbers<[1], [0], [0], [1], [0, 0, 1, 1], [], []>} : vector<8x128xf32>, vector<128x512xf32>, vector<8x512xf32> -> vector<8x512xf32>
    %195 = arith.addf %193, %194 : vector<8x512xf32>
    %196 = arith.addf %195, %7 : vector<8x512xf32>
    %197 = vector.extract_strided_slice %196 {offsets = [0, 0], sizes = [8, 128], strides = [1, 1]} : vector<8x512xf32> to vector<8x128xf32>
    %198 = arith.negf %197 : vector<8x128xf32>
    %199 = math.exp %198 : vector<8x128xf32>
    %cst_59 = arith.constant 1.000000e+00 : f32
    %200 = vector.broadcast %cst_59 : f32 to vector<8x128xf32>
    %201 = arith.addf %200, %199 : vector<8x128xf32>
    %202 = arith.divf %200, %201 : vector<8x128xf32>
    %203 = vector.extract_strided_slice %196 {offsets = [0, 128], sizes = [8, 128], strides = [1, 1]} : vector<8x512xf32> to vector<8x128xf32>
    %204 = arith.negf %203 : vector<8x128xf32>
    %205 = math.exp %204 : vector<8x128xf32>
    %cst_60 = arith.constant 1.000000e+00 : f32
    %206 = vector.broadcast %cst_60 : f32 to vector<8x128xf32>
    %207 = arith.addf %206, %205 : vector<8x128xf32>
    %208 = arith.divf %206, %207 : vector<8x128xf32>
    %209 = vector.extract_strided_slice %196 {offsets = [0, 256], sizes = [8, 128], strides = [1, 1]} : vector<8x512xf32> to vector<8x128xf32>
    %210 = math.tanh %209 : vector<8x128xf32>
    %211 = vector.extract_strided_slice %196 {offsets = [0, 384], sizes = [8, 128], strides = [1, 1]} : vector<8x512xf32> to vector<8x128xf32>
    %212 = arith.negf %211 : vector<8x128xf32>
    %213 = math.exp %212 : vector<8x128xf32>
    %cst_61 = arith.constant 1.000000e+00 : f32
    %214 = vector.broadcast %cst_61 : f32 to vector<8x128xf32>
    %215 = arith.addf %214, %213 : vector<8x128xf32>
    %216 = arith.divf %214, %215 : vector<8x128xf32>
    %217 = arith.mulf %208, %183 : vector<8x128xf32>
    %218 = arith.mulf %202, %210 : vector<8x128xf32>
    %219 = arith.addf %217, %218 : vector<8x128xf32>
    %220 = math.tanh %219 : vector<8x128xf32>
    %221 = arith.mulf %216, %220 : vector<8x128xf32>
    %222 = arith.index_cast %c5_i32 : i32 to index
    %c0_62 = arith.constant 0 : index
    %c0_63 = arith.constant 0 : index
    %223 = vector.load %arg6[%222, %c0_62, %c0_63] : memref<7x8x128xf32, #tpu.memory_space<vmem>>, vector<1x8x128xf32>
    %224 = vector.shape_cast %223 : vector<1x8x128xf32> to vector<8x128xf32>
    %225 = vector.shape_cast %221 : vector<8x128xf32> to vector<1x8x128xf32>
    tpu.vector_store %arg6[%222, %c0_62, %c0_63], %225 {strides = array<i32>} : memref<7x8x128xf32, #tpu.memory_space<vmem>>, vector<1x8x128xf32>,
    %c6_i32 = arith.constant 6 : i32
    %226 = arith.index_cast %c6_i32 : i32 to index
    %c0_64 = arith.constant 0 : index
    %c0_65 = arith.constant 0 : index
    %227 = vector.load %arg1[%226, %c0_64, %c0_65] : memref<7x8x32xf32, #tpu.memory_space<vmem>>, vector<1x8x32xf32>
    %228 = vector.shape_cast %227 : vector<1x8x32xf32> to vector<8x32xf32>
    %cst_66 = arith.constant dense<0.000000e+00> : vector<8x512xf32>
    %229 = tpu.matmul %228, %3, %cst_66 {dimension_numbers = #tpu.dot_dimension_numbers<[1], [0], [0], [1], [0, 0, 1, 1], [], []>} : vector<8x32xf32>, vector<32x512xf32>, vector<8x512xf32> -> vector<8x512xf32>
    %cst_67 = arith.constant dense<0.000000e+00> : vector<8x512xf32>
    %230 = tpu.matmul %221, %4, %cst_67 {dimension_numbers = #tpu.dot_dimension_numbers<[1], [0], [0], [1], [0, 0, 1, 1], [], []>} : vector<8x128xf32>, vector<128x512xf32>, vector<8x512xf32> -> vector<8x512xf32>
    %231 = arith.addf %229, %230 : vector<8x512xf32>
    %232 = arith.addf %231, %7 : vector<8x512xf32>
    %233 = vector.extract_strided_slice %232 {offsets = [0, 0], sizes = [8, 128], strides = [1, 1]} : vector<8x512xf32> to vector<8x128xf32>
    %234 = arith.negf %233 : vector<8x128xf32>
    %235 = math.exp %234 : vector<8x128xf32>
    %cst_68 = arith.constant 1.000000e+00 : f32
    %236 = vector.broadcast %cst_68 : f32 to vector<8x128xf32>
    %237 = arith.addf %236, %235 : vector<8x128xf32>
    %238 = arith.divf %236, %237 : vector<8x128xf32>
    %239 = vector.extract_strided_slice %232 {offsets = [0, 128], sizes = [8, 128], strides = [1, 1]} : vector<8x512xf32> to vector<8x128xf32>
    %240 = arith.negf %239 : vector<8x128xf32>
    %241 = math.exp %240 : vector<8x128xf32>
    %cst_69 = arith.constant 1.000000e+00 : f32
    %242 = vector.broadcast %cst_69 : f32 to vector<8x128xf32>
    %243 = arith.addf %242, %241 : vector<8x128xf32>
    %244 = arith.divf %242, %243 : vector<8x128xf32>
    %245 = vector.extract_strided_slice %232 {offsets = [0, 256], sizes = [8, 128], strides = [1, 1]} : vector<8x512xf32> to vector<8x128xf32>
    %246 = math.tanh %245 : vector<8x128xf32>
    %247 = vector.extract_strided_slice %232 {offsets = [0, 384], sizes = [8, 128], strides = [1, 1]} : vector<8x512xf32> to vector<8x128xf32>
    %248 = arith.negf %247 : vector<8x128xf32>
    %249 = math.exp %248 : vector<8x128xf32>
    %cst_70 = arith.constant 1.000000e+00 : f32
    %250 = vector.broadcast %cst_70 : f32 to vector<8x128xf32>
    %251 = arith.addf %250, %249 : vector<8x128xf32>
    %252 = arith.divf %250, %251 : vector<8x128xf32>
    %253 = arith.mulf %244, %219 : vector<8x128xf32>
    %254 = arith.mulf %238, %246 : vector<8x128xf32>
    %255 = arith.addf %253, %254 : vector<8x128xf32>
    %256 = math.tanh %255 : vector<8x128xf32>
    %257 = arith.mulf %252, %256 : vector<8x128xf32>
    %258 = arith.index_cast %c6_i32 : i32 to index
    %c0_71 = arith.constant 0 : index
    %c0_72 = arith.constant 0 : index
    %259 = vector.load %arg6[%258, %c0_71, %c0_72] : memref<7x8x128xf32, #tpu.memory_space<vmem>>, vector<1x8x128xf32>
    %260 = vector.shape_cast %259 : vector<1x8x128xf32> to vector<8x128xf32>
    %261 = vector.shape_cast %257 : vector<8x128xf32> to vector<1x8x128xf32>
    tpu.vector_store %arg6[%258, %c0_71, %c0_72], %261 {strides = array<i32>} : memref<7x8x128xf32, #tpu.memory_space<vmem>>, vector<1x8x128xf32>,
    %c7_i32 = arith.constant 7 : i32
    %c0_73 = arith.constant 0 : index
    %c0_74 = arith.constant 0 : index
    %262 = vector.load %arg7[%c0_73, %c0_74] : memref<8x128xf32, #tpu.memory_space<vmem>>, vector<8x128xf32>
    tpu.vector_store %arg7[%c0_73, %c0_74], %257 {strides = array<i32>} : memref<8x128xf32, #tpu.memory_space<vmem>>, vector<8x128xf32>,
    %c0_75 = arith.constant 0 : index
    %c0_76 = arith.constant 0 : index
    %263 = vector.load %arg8[%c0_75, %c0_76] : memref<8x128xf32, #tpu.memory_space<vmem>>, vector<8x128xf32>
    tpu.vector_store %arg8[%c0_75, %c0_76], %255 {strides = array<i32>} : memref<8x128xf32, #tpu.memory_space<vmem>>, vector<8x128xf32>,
    return
  }
  func.func @transform_0(%arg0: i32) -> (i32, i32, i32) {
    %c0_i32 = arith.constant 0 : i32
    %c0_i32_0 = arith.constant 0 : i32
    %c0_i32_1 = arith.constant 0 : i32
    return %arg0, %c0_i32, %c0_i32_0 : i32, i32, i32
  }
  func.func @transform_1(%arg0: i32) -> (i32, i32) {
    %c0_i32 = arith.constant 0 : i32
    %c0_i32_0 = arith.constant 0 : i32
    %c0_i32_1 = arith.constant 0 : i32
    return %c0_i32, %c0_i32_0 : i32, i32
  }
  func.func @transform_2(%arg0: i32) -> (i32, i32) {
    %c0_i32 = arith.constant 0 : i32
    %c0_i32_0 = arith.constant 0 : i32
    %c0_i32_1 = arith.constant 0 : i32
    return %c0_i32, %c0_i32_0 : i32, i32
  }
  func.func @transform_3(%arg0: i32) -> (i32, i32) {
    %c0_i32 = arith.constant 0 : i32
    %c0_i32_0 = arith.constant 0 : i32
    %c0_i32_1 = arith.constant 0 : i32
    return %c0_i32, %c0_i32_0 : i32, i32
  }
  func.func @transform_4(%arg0: i32) -> (i32, i32) {
    %c0_i32 = arith.constant 0 : i32
    %c0_i32_0 = arith.constant 0 : i32
    %c0_i32_1 = arith.constant 0 : i32
    return %c0_i32, %c0_i32_0 : i32, i32
  }
  func.func @transform_5(%arg0: i32) -> (i32, i32, i32) {
    %c0_i32 = arith.constant 0 : i32
    %c0_i32_0 = arith.constant 0 : i32
    %c0_i32_1 = arith.constant 0 : i32
    return %arg0, %c0_i32, %c0_i32_0 : i32, i32, i32
  }
}

</mosaic_0001>

<bundles_post_ra>
// kernel: decoder_rnn_forward.1
= control target key start
LH: loop header
LB: loop body
LE: loop exit
PB: predicated region body
PF: predicated region fallthrough
CT: control target
= control target key end

     0   :  { %v3117_v3 = vmov 0.0   ;;  %vm274_vm0 = vcmask 261120   ;;  %s3899_s3 = inlined_call_operand.vmem [shape: f32[128,512], index: 3, kind: input, shape index: {}]   ;;  %s3900_s2 = inlined_call_operand.vmem [shape: f32[32,512], index: 2, kind: input, shape index: {}]   ;;  %s3901_s1 = inlined_call_operand.vmem [shape: f32[8,128], index: 1, kind: input, shape index: {}]   ;;  %s3902_s0 = inlined_call_operand.vmem [shape: f32[7,8,32], index: 0, kind: input, shape index: {}]   ;;  %s3903_s4 = inlined_call_operand.vmem [shape: f32[1,512], index: 4, kind: input, shape index: {}]   ;;  %s3904_s5 = inlined_call_operand.vmem [shape: f32[7,8,128], index: 5, kind: output, shape index: {}]  }
   0x1   :  { %v44_v0 = vld [vmem:[%s3899_s3 + $0x8] sm:$0xff]  ;;  %v43_v2 = vld [vmem:[%s3899_s3] sm:$0xff]  ;;  %196 = vmatprep.mubr.f32.mxu0 %v3117_v3  ;;  %267 = vmatprep.mubr.f32.mxu1 %v3117_v3  ;;  %v46_v12 = vld [vmem:[%s3899_s3 + $0x18] sm:$0xff] }
   0x2   :  { %v48_v1 = vld [vmem:[%s3899_s3 + $0x28] sm:$0xff]  ;;  %v47_v5 = vld [vmem:[%s3899_s3 + $0x20] sm:$0xff]  ;;  %v50_v13 = vld [vmem:[%s3899_s3 + $0x38] sm:$0xff] }
   0x3   :  { %v3159_v4 = vpack.c.bf16 %v48_v1, %v44_v0  ;;  %v52_v6 = vld [vmem:[%s3899_s3 + $0x48] sm:$0xff]  ;;  %v3170_v8 = vpack.c.bf16 %v47_v5, %v43_v2  ;;  %v51_v10 = vld [vmem:[%s3899_s3 + $0x40] sm:$0xff]  ;;  %v3196_v17 = vpack.c.bf16 %v50_v13, %v46_v12  ;;  %v45_v18 = vld [vmem:[%s3899_s3 + $0x10] sm:$0xff] }
   0x4   :  { %v56_v7 = vld [vmem:[%s3899_s3 + $0x68] sm:$0xff]  ;;  %v55_v11 = vld [vmem:[%s3899_s3 + $0x60] sm:$0xff]  ;;  %v49_v19 = vld [vmem:[%s3899_s3 + $0x30] sm:$0xff] }
   0x5   :  { %v3172_v9 = vpack.c.bf16 %v56_v7, %v52_v6  ;;  %2417 = vmatprep.subr.bf16.mxu0 %v3159_v4  ;;  %v60_v14 = vld [vmem:[%s3899_s3 + $0x88] sm:$0xff]  ;;  %v3194_v16 = vpack.c.bf16 %v55_v11, %v51_v10  ;;  %v59_v20 = vld [vmem:[%s3899_s3 + $0x80] sm:$0xff]  ;;  %v3210_v22 = vpack.c.bf16 %v49_v19, %v45_v18  ;;  %v54_v24 = vld [vmem:[%s3899_s3 + $0x58] sm:$0xff]  ;;  %2449 = vmatprep.subr.bf16.mxu1 %v3196_v17 }
   0x6   :  { %v64_v15 = vld [vmem:[%s3899_s3 + $0xa8] sm:$0xff]  ;;  %2419 = vmatpush1.bf16.msra.mxu0 %v3170_v8  ;;  %v63_v23 = vld [vmem:[%s3899_s3 + $0xa0] sm:$0xff]  ;;  %v58_v25 = vld [vmem:[%s3899_s3 + $0x78] sm:$0xff] }
   0x7   :  { %2421 = vmatprep.subr.bf16.mxu0 %v3172_v9  ;;  %v3208_v21 = vpack.c.bf16 %v64_v15, %v60_v14  ;;  %v3222_v26 = vpack.c.bf16 %v58_v25, %v54_v24  ;;  %v68_v27 = vld [vmem:[%s3899_s3 + $0xc8] sm:$0xff]  ;;  %v53_v29 = vld [vmem:[%s3899_s3 + $0x50] sm:$0xff]  ;;  %2451 = vmatpush1.bf16.msra.mxu1 %v3210_v22  ;;  %v3238_v31 = vpack.c.bf16 %v63_v23, %v59_v20  ;;  %v67_v33 = vld [vmem:[%s3899_s3 + $0xc0] sm:$0xff] }
   0x8   :  { %v72_v28 = vld [vmem:[%s3899_s3 + $0xe8] sm:$0xff]  ;;  %v57_v30 = vld [vmem:[%s3899_s3 + $0x70] sm:$0xff]  ;;  %v62_v34 = vld [vmem:[%s3899_s3 + $0x98] sm:$0xff] }
   0x9   :  { %2453 = vmatprep.subr.bf16.mxu1 %v3222_v26  ;;  %v3241_v32 = vpack.c.bf16 %v57_v30, %v53_v29  ;;  %v66_v35 = vld [vmem:[%s3899_s3 + $0xb8] sm:$0xff]  ;;  %v3253_v36 = vpack.c.bf16 %v72_v28, %v68_v27  ;;  %v71_v37 = vld [vmem:[%s3899_s3 + $0xe0] sm:$0xff]  ;;  %v61_v39 = vld [vmem:[%s3899_s3 + $0x90] sm:$0xff] }
   0xa   :  { %2423 = vmatpush1.bf16.msra.mxu0 %v3194_v16  ;;  %v3258_v38 = vpack.c.bf16 %v66_v35, %v62_v34  ;;  %v65_v40 = vld [vmem:[%s3899_s3 + $0xb0] sm:$0xff]  ;;  %v76_v41 = vld [vmem:[%s3899_s3 + $0x108] sm:$0xff]  ;;  %v70_v43 = vld [vmem:[%s3899_s3 + $0xd8] sm:$0xff]  ;;  %v3282_v46 = vpack.c.bf16 %v71_v37, %v67_v33 }
   0xb   :  { %2425 = vmatprep.subr.bf16.mxu0 %v3208_v21  ;;  %v80_v42 = vld [vmem:[%s3899_s3 + $0x128] sm:$0xff]  ;;  %2455 = vmatpush1.bf16.msra.mxu1 %v3241_v32  ;;  %v3276_v44 = vpack.c.bf16 %v65_v40, %v61_v39  ;;  %v74_v45 = vld [vmem:[%s3899_s3 + $0xf8] sm:$0xff]  ;;  %v75_v47 = vld [vmem:[%s3899_s3 + $0x100] sm:$0xff] }
   0xc   :  { %2457 = vmatprep.subr.bf16.mxu1 %v3258_v38  ;;  %v3288_v48 = vpack.c.bf16 %v74_v45, %v70_v43  ;;  %v69_v49 = vld [vmem:[%s3899_s3 + $0xd0] sm:$0xff]  ;;  %v3297_v51 = vpack.c.bf16 %v80_v42, %v76_v41  ;;  %v79_v52 = vld [vmem:[%s3899_s3 + $0x120] sm:$0xff]  ;;  %v78_v53 = vld [vmem:[%s3899_s3 + $0x118] sm:$0xff] }
   0xd   :  { %v73_v50 = vld [vmem:[%s3899_s3 + $0xf0] sm:$0xff]  ;;  %v82_v54 = vld [vmem:[%s3899_s3 + $0x138] sm:$0xff]  ;;  %v84_v55 = vld [vmem:[%s3899_s3 + $0x148] sm:$0xff]  ;;  %v3318_v58 = vpack.c.bf16 %v79_v52, %v75_v47 }
   0xe   :  { %2427 = vmatpush1.bf16.msra.mxu0 %v3238_v31  ;;  %v88_v56 = vld [vmem:[%s3899_s3 + $0x168] sm:$0xff]  ;;  %v3315_v57 = vpack.c.bf16 %v73_v50, %v69_v49  ;;  %v83_v59 = vld [vmem:[%s3899_s3 + $0x140] sm:$0xff]  ;;  %v3324_v60 = vpack.c.bf16 %v82_v54, %v78_v53  ;;  %v77_v61 = vld [vmem:[%s3899_s3 + $0x110] sm:$0xff] }
   0xf   :  { %2429 = vmatprep.subr.bf16.mxu0 %v3253_v36  ;;  %2459 = vmatpush1.bf16.msra.mxu1 %v3276_v44  ;;  %v81_v62 = vld [vmem:[%s3899_s3 + $0x130] sm:$0xff]  ;;  %v3333_v63 = vpack.c.bf16 %v88_v56, %v84_v55  ;;  %v87_v0 = vld [vmem:[%s3899_s3 + $0x160] sm:$0xff]  ;;  %v86_v1 = vld [vmem:[%s3899_s3 + $0x158] sm:$0xff] }
  0x10   :  { %2461 = vmatprep.subr.bf16.mxu1 %v3288_v48  ;;  %v90_v2 = vld [vmem:[%s3899_s3 + $0x178] sm:$0xff]  ;;  %v92_v5 = vld [vmem:[%s3899_s3 + $0x188] sm:$0xff]  ;;  %v3351_v7 = vpack.c.bf16 %v81_v62, %v77_v61  ;;  %v3354_v10 = vpack.c.bf16 %v87_v0, %v83_v59  ;;  %v91_v11 = vld [vmem:[%s3899_s3 + $0x180] sm:$0xff] }
  0x11   :  { %v96_v6 = vld [vmem:[%s3899_s3 + $0x1a8] sm:$0xff]  ;;  %v3360_v12 = vpack.c.bf16 %v90_v2, %v86_v1  ;;  %v85_v13 = vld [vmem:[%s3899_s3 + $0x150] sm:$0xff]  ;;  %v95_v18 = vld [vmem:[%s3899_s3 + $0x1a0] sm:$0xff] }
  0x12   :  { %2431 = vmatpush1.bf16.msra.mxu0 %v3282_v46  ;;  %v89_v14 = vld [vmem:[%s3899_s3 + $0x170] sm:$0xff]  ;;  %v3369_v15 = vpack.c.bf16 %v96_v6, %v92_v5  ;;  %v94_v19 = vld [vmem:[%s3899_s3 + $0x198] sm:$0xff]  ;;  %v100_v23 = vld [vmem:[%s3899_s3 + $0x1c8] sm:$0xff]  ;;  %v3390_v27 = vpack.c.bf16 %v95_v18, %v91_v11 }
  0x13   :  { %2433 = vmatprep.subr.bf16.mxu0 %v3297_v51  ;;  %2463 = vmatpush1.bf16.msra.mxu1 %v3315_v57  ;;  %v98_v20 = vld [vmem:[%s3899_s3 + $0x1b8] sm:$0xff]  ;;  %v104_v24 = vld [vmem:[%s3899_s3 + $0x1e8] sm:$0xff]  ;;  %v3387_v25 = vpack.c.bf16 %v89_v14, %v85_v13  ;;  %v99_v28 = vld [vmem:[%s3899_s3 + $0x1c0] sm:$0xff] }
  0x14   :  { %2465 = vmatprep.subr.bf16.mxu1 %v3324_v60  ;;  %v3396_v29 = vpack.c.bf16 %v98_v20, %v94_v19  ;;  %v93_v30 = vld [vmem:[%s3899_s3 + $0x190] sm:$0xff]  ;;  %v3405_v34 = vpack.c.bf16 %v104_v24, %v100_v23  ;;  %v103_v35 = vld [vmem:[%s3899_s3 + $0x1e0] sm:$0xff]  ;;  %v102_v37 = vld [vmem:[%s3899_s3 + $0x1d8] sm:$0xff] }
  0x15   :  { %v97_v33 = vld [vmem:[%s3899_s3 + $0x1b0] sm:$0xff]  ;;  %v106_v39 = vld [vmem:[%s3899_s3 + $0x1f8] sm:$0xff]  ;;  %v28_v40 = vld [vmem:[%s3900_s2 + $0x8] sm:$0xff]  ;;  %v3426_v43 = vpack.c.bf16 %v103_v35, %v99_v28  ;;  %v109_v35 = vlaneseq }
  0x16   :  { %2435 = vmatpush1.bf16.msra.mxu0 %v3318_v58  ;;  %v32_v41 = vld [vmem:[%s3900_s2 + $0x28] sm:$0xff]  ;;  %v3423_v42 = vpack.c.bf16 %v97_v33, %v93_v30  ;;  %v3429_v45 = vpack.c.bf16 %v106_v39, %v102_v37  ;;  %v101_v47 = vld [vmem:[%s3899_s3 + $0x1d0] sm:$0xff]  ;;  %v27_v52 = vld [vmem:[%s3900_s2] sm:$0xff] }
  0x17   :  { %2437 = vmatprep.subr.bf16.mxu0 %v3333_v63  ;;  %2467 = vmatpush1.bf16.msra.mxu1 %v3351_v7  ;;  %v105_v49 = vld [vmem:[%s3899_s3 + $0x1f0] sm:$0xff]  ;;  %v3438_v50 = vpack.c.bf16 %v32_v41, %v28_v40  ;;  %v31_v53 = vld [vmem:[%s3900_s2 + $0x20] sm:$0xff]  ;;  %v36_v54 = vld [vmem:[%s3900_s2 + $0x48] sm:$0xff]  ;;  %v110_v37 = vshrl.u32 %v109_v35, 7 }
  0x18   :  { %2469 = vmatprep.subr.bf16.mxu1 %v3360_v12  ;;  %v40_v55 = vld [vmem:[%s3900_s2 + $0x68] sm:$0xff]  ;;  %v30_v56 = vld [vmem:[%s3900_s2 + $0x18] sm:$0xff]  ;;  %v3461_v61 = vld [vmem:[%s3901_s1] sm:$0xff]  ;;  %v3464_v62 = vpack.c.bf16 %v105_v49, %v101_v47  ;;  %v3467_v0 = vpack.c.bf16 %v31_v53, %v27_v52 }
  0x19   :  { %v34_v59 = vld [vmem:[%s3900_s2 + $0x38] sm:$0xff]  ;;  %v35_v1 = vld [vmem:[%s3900_s2 + $0x40] sm:$0xff]  ;;  %v29_v2 = vld [vmem:[%s3900_s2 + $0x10] sm:$0xff]  ;;  %v3480_v6 = vpack.c.bf16 %v40_v55, %v36_v54  ;;  %v111_v39 = vsub.s32 0, %v110_v37  ;;  %v115_v41 = vsub.s32 1, %v110_v37  ;;  %v123_v53 = vsub.s32 3, %v110_v37 }
  0x1a   :  { %2439 = vmatpush1.bf16.msra.mxu0 %v3354_v10  ;;  %v33_v5 = vld [vmem:[%s3900_s2 + $0x30] sm:$0xff]  ;;  %v39_v11 = vld [vmem:[%s3900_s2 + $0x60] sm:$0xff]  ;;  %v3485_v13 = vpack.c.bf16 %v34_v59, %v30_v56  ;;  %v38_v14 = vld [vmem:[%s3900_s2 + $0x58] sm:$0xff] }
  0x1b   :  { %2441 = vmatprep.subr.bf16.mxu0 %v3369_v15  ;;  %2471 = vmatpush1.bf16.msra.mxu1 %v3387_v25  ;;  %v42_v18 = vld [vmem:[%s3900_s2 + $0x78] sm:$0xff]  ;;  %v3495_v19 = vpack.c.bf16 %v33_v5, %v29_v2  ;;  %v3498_v20 = vpack.c.bf16 %v39_v11, %v35_v1  ;;  %v37_v24 = vld [vmem:[%s3900_s2 + $0x50] sm:$0xff]  ;;  %v131_v33 = vld [vmem:[%s3902_s0] sm:$0xff] }
  0x1c   :  { %2473 = vmatprep.subr.bf16.mxu1 %v3396_v29  ;;  %v3501_v23 = vpack.c.bf16 %v42_v18, %v38_v14  ;;  %v41_v28 = vld [vmem:[%s3900_s2 + $0x70] sm:$0xff]  ;;  %v107_v40 = vld [vmem:[%s3903_s4] sm:$0xf]  ;;  %v119_v14 = vsub.s32 2, %v110_v37 }
  0x1d   :  { %v3513_v30 = vpack.c.bf16 %v41_v28, %v37_v24  ;;  %v3563_v47 = vrot.slane %v107_v40, %v111_v39  ;;  %v3565_v49 = vrot.slane %v107_v40, %v115_v41  ;;  %v3569_v5 = vrot.slane %v107_v40, %v123_v53 }
  0x1e   :  { %2443 = vmatpush1.bf16.msra.mxu0 %v3390_v27  ;;  %v3572_v24 = vrot.slane %v107_v40, %v119_v14 }
  0x1f   :  { %2445 = vmatprep.subr.bf16.mxu0 %v3405_v34  ;;  %2475 = vmatpush1.bf16.msra.mxu1 %v3423_v42 }
  0x20   :  { %2477 = vmatprep.subr.bf16.mxu1 %v3429_v45 }
  0x22   :  { %2447 = vmatpush1.bf16.msra.mxu0 %v3426_v43 }
  0x23   :  { %2481 = vmatprep.subr.bf16.mxu0 %v3438_v50  ;;  %2479 = vmatpush1.bf16.msra.mxu1 %v3464_v62 }
  0x24   :  { %2489 = vmatprep.subr.bf16.mxu1 %v3485_v13 }
  0x25   :  { %197 = vmatmul.mubr.f32.vlgmr.msra.gmra.mrb[0].mxu0 %v3461_v61 }
  0x26   :  { %2483 = vmatpush1.bf16.msra.mxu0 %v3467_v0  ;;  %342 = vmatprep.mubr.f32.mxu0 %v3117_v3 }
  0x27   :  { %2485 = vmatprep.subr.bf16.mxu0 %v3480_v6  ;;  %268 = vmatmul.mubr.f32.vlgmr.msra.gmra.mrb[0].mxu1 %v3461_v61 }
  0x28   :  { %2491 = vmatpush1.bf16.msra.mxu1 %v3495_v19  ;;  %413 = vmatprep.mubr.f32.mxu1 %v3117_v3 }
  0x29   :  { %2493 = vmatprep.subr.bf16.mxu1 %v3501_v23 }
  0x2a   :  { %2487 = vmatpush1.bf16.msra.mxu0 %v3498_v20 }
  0x2b   :  { %2497 = vmatprep.subr.bf16.mxu0 %v3159_v4 }
  0x2c   :  { %2495 = vmatpush1.bf16.msra.mxu1 %v3513_v30 }
  0x2d   :  { %2369 = vmatmul.mubr.msk.f32.vlgmr.msra.gmra.mrb[0].mxu0 %vm274_vm0, %v131_v33  ;;  %2529 = vmatprep.subr.bf16.mxu1 %v3196_v17 }
  0x2e   :  { %2499 = vmatpush1.bf16.msra.mxu0 %v3170_v8  ;;  %515 = vmatprep.mubr.f32.mxu0 %v3117_v3 }
  0x2f   :  { %2501 = vmatprep.subr.bf16.mxu0 %v3172_v9  ;;  %2370 = vmatmul.mubr.msk.f32.vlgmr.msra.gmra.mrb[0].mxu1 %vm274_vm0, %v131_v33 }
  0x30   :  { %2531 = vmatpush1.bf16.msra.mxu1 %v3210_v22  ;;  %586 = vmatprep.mubr.f32.mxu1 %v3117_v3 }
  0x31   :  { %2533 = vmatprep.subr.bf16.mxu1 %v3222_v26 }
  0x32   :  { %2503 = vmatpush1.bf16.msra.mxu0 %v3194_v16 }
  0x33   :  { %2505 = vmatprep.subr.bf16.mxu0 %v3208_v21 }
  0x34   :  { %2535 = vmatpush1.bf16.msra.mxu1 %v3241_v32 }
  0x35   :  { %2537 = vmatprep.subr.bf16.mxu1 %v3258_v38 }
  0x36   :  { %2507 = vmatpush1.bf16.msra.mxu0 %v3238_v31 }
  0x37   :  { %2509 = vmatprep.subr.bf16.mxu0 %v3253_v36 }
  0x38   :  { %2539 = vmatpush1.bf16.msra.mxu1 %v3276_v44 }
  0x39   :  { %2541 = vmatprep.subr.bf16.mxu1 %v3288_v48 }
  0x3a   :  { %2511 = vmatpush1.bf16.msra.mxu0 %v3282_v46 }
  0x3b   :  { %2513 = vmatprep.subr.bf16.mxu0 %v3297_v51 }
  0x3c   :  { %2543 = vmatpush1.bf16.msra.mxu1 %v3315_v57 }
  0x3d   :  { %2545 = vmatprep.subr.bf16.mxu1 %v3324_v60 }
  0x3e   :  { %2515 = vmatpush1.bf16.msra.mxu0 %v3318_v58 }
  0x3f   :  { %2517 = vmatprep.subr.bf16.mxu0 %v3333_v63 }
  0x40   :  { %2547 = vmatpush1.bf16.msra.mxu1 %v3351_v7 }
  0x41   :  { %2549 = vmatprep.subr.bf16.mxu1 %v3360_v12 }
  0x42   :  { %2519 = vmatpush1.bf16.msra.mxu0 %v3354_v10 }
  0x43   :  { %2521 = vmatprep.subr.bf16.mxu0 %v3369_v15 }
  0x44   :  { %2551 = vmatpush1.bf16.msra.mxu1 %v3387_v25 }
  0x45   :  { %2553 = vmatprep.subr.bf16.mxu1 %v3396_v29 }
  0x46   :  { %2523 = vmatpush1.bf16.msra.mxu0 %v3390_v27 }
  0x47   :  { %2525 = vmatprep.subr.bf16.mxu0 %v3405_v34 }
  0x48   :  { %2555 = vmatpush1.bf16.msra.mxu1 %v3423_v42 }
  0x49   :  { %2557 = vmatprep.subr.bf16.mxu1 %v3429_v45 }
  0x4a   :  { %2527 = vmatpush1.bf16.msra.mxu0 %v3426_v43 }
  0x4b   :  { %2561 = vmatprep.subr.bf16.mxu0 %v3438_v50 }
  0x4c   :  { %2559 = vmatpush1.bf16.msra.mxu1 %v3464_v62 }
  0x4d   :  { %2569 = vmatprep.subr.bf16.mxu1 %v3485_v13 }
 0x100   :  { %v344_v52 = vpop.f32.mrb[0].mxu0 }
 0x101   :  { %v420_v54 = vadd.f32 %v344_v52, %v3563_v47  ;;  %v346_v55 = vpop.f32.mrb[1].mxu0 }
 0x102   :  { %v421_v56 = vadd.f32 %v346_v55, %v3565_v49  ;;  %v415_v1 = vpop.f32.mrb[0].mxu1 }
 0x103   :  { %v2371_v59 = vmul.f32 -1.442695, %v420_v54  ;;  %v417_v11 = vpop.f32.mrb[1].mxu1  ;;  %v422_v33 = vadd.f32 %v415_v1, %v3572_v24 }
 0x104   :  { %v2372_v2 = vmul.f32 -1.442695, %v421_v56  ;;  %v423_v18 = vadd.f32 %v417_v11, %v3569_v5 }
 0x105   :  { %3005 = vpow2.f32 %v2371_v59 }
 0x106   :  { %3007 = vpow2.f32 %v2372_v2  ;;  %v2373_v28 = vmul.f32 -1.442695, %v423_v18 }
 0x108   :  { %3009 = vpow2.f32 %v2373_v28 }
 0x109   :  { %3011 = vtanh.f32 %v422_v33 }
 0x10f   :  { %v3006_v35 = vpop.eup %3005 }
 0x110   :  { %v3008_v39 = vpop.eup %3007  ;;  %v427_v41 = vadd.f32 1.0, %v3006_v35 }
 0x111   :  { %v433_v52 = vadd.f32 1.0, %v3008_v39 }
 0x112   :  { %3013 = vrcp.f32 %v427_v41  ;;  %v3010_v53 = vpop.eup %3009 }
 0x113   :  { %3015 = vrcp.f32 %v433_v52  ;;  %v3012_v54 = vpop.eup %3011  ;;  %v440_v59 = vadd.f32 1.0, %v3010_v53 }
 0x115   :  { %3017 = vrcp.f32 %v440_v59 }
 0x11c   :  { %v3014_v55 = vpop.eup %3013 }
 0x11d   :  { %v3016_v37 = vpop.eup %3015  ;;  %v444_v56 = vmul.f32 %v3014_v55, %v3012_v54 }
 0x11e   :  { %v443_v40 = vmul.f32 %v3016_v37, %v3461_v61  ;;  %v2374_v61 = vld [vmem:[%s3902_s0 + $0x8] sm:$0xff] }
 0x11f   :  { %v3018_v1 = vpop.eup %3017 }
 0x120   :  { %v3576_v2 = vadd.f32 %v444_v56, %v443_v40 }
 0x122   :  { %3019 = vtanh.f32 %v3576_v2 }
 0x12c   :  { %v3020_v11 = vpop.eup %3019 }
 0x12d   :  { %v447_v14 = vmul.f32 %v3020_v11, %v3018_v1 }
 0x12f   :  { %448 = vst [vmem:[%s3904_s5] sm:$0xff] %v447_v14  ;;  %516 = vmatmul.mubr.f32.vlgmr.msra.gmra.mrb[2].mxu0 %v447_v14  ;;  %587 = vmatmul.mubr.f32.vlgmr.msra.gmra.mrb[2].mxu1 %v447_v14 }
 0x130   :  { %2563 = vmatpush1.bf16.msra.mxu0 %v3467_v0  ;;  %2571 = vmatpush1.bf16.msra.mxu1 %v3495_v19 }
 0x131   :  { %2565 = vmatprep.subr.bf16.mxu0 %v3480_v6  ;;  %2573 = vmatprep.subr.bf16.mxu1 %v3501_v23 }
 0x132   :  { %660 = vmatprep.mubr.f32.mxu0 %v3117_v3  ;;  %731 = vmatprep.mubr.f32.mxu1 %v3117_v3 }
 0x134   :  { %2567 = vmatpush1.bf16.msra.mxu0 %v3498_v20  ;;  %2575 = vmatpush1.bf16.msra.mxu1 %v3513_v30 }
 0x135   :  { %2577 = vmatprep.subr.bf16.mxu0 %v3159_v4  ;;  %2609 = vmatprep.subr.bf16.mxu1 %v3196_v17 }
 0x137   :  { %2375 = vmatmul.mubr.msk.f32.vlgmr.msra.gmra.mrb[2].mxu0 %vm274_vm0, %v2374_v61  ;;  %2376 = vmatmul.mubr.msk.f32.vlgmr.msra.gmra.mrb[2].mxu1 %vm274_vm0, %v2374_v61 }
 0x138   :  { %2579 = vmatpush1.bf16.msra.mxu0 %v3170_v8  ;;  %2611 = vmatpush1.bf16.msra.mxu1 %v3210_v22 }
 0x139   :  { %2581 = vmatprep.subr.bf16.mxu0 %v3172_v9  ;;  %2613 = vmatprep.subr.bf16.mxu1 %v3222_v26 }
 0x13a   :  { %834 = vmatprep.mubr.f32.mxu0 %v3117_v3  ;;  %905 = vmatprep.mubr.f32.mxu1 %v3117_v3 }
 0x13c   :  { %2583 = vmatpush1.bf16.msra.mxu0 %v3194_v16  ;;  %2615 = vmatpush1.bf16.msra.mxu1 %v3241_v32 }
 0x13d   :  { %2585 = vmatprep.subr.bf16.mxu0 %v3208_v21  ;;  %2617 = vmatprep.subr.bf16.mxu1 %v3258_v38 }
 0x140   :  { %2587 = vmatpush1.bf16.msra.mxu0 %v3238_v31  ;;  %2619 = vmatpush1.bf16.msra.mxu1 %v3276_v44 }
 0x141   :  { %2589 = vmatprep.subr.bf16.mxu0 %v3253_v36  ;;  %2621 = vmatprep.subr.bf16.mxu1 %v3288_v48 }
 0x144   :  { %2591 = vmatpush1.bf16.msra.mxu0 %v3282_v46  ;;  %2623 = vmatpush1.bf16.msra.mxu1 %v3315_v57 }
 0x145   :  { %2593 = vmatprep.subr.bf16.mxu0 %v3297_v51  ;;  %2625 = vmatprep.subr.bf16.mxu1 %v3324_v60 }
 0x148   :  { %2595 = vmatpush1.bf16.msra.mxu0 %v3318_v58  ;;  %2627 = vmatpush1.bf16.msra.mxu1 %v3351_v7 }
 0x149   :  { %2597 = vmatprep.subr.bf16.mxu0 %v3333_v63  ;;  %2629 = vmatprep.subr.bf16.mxu1 %v3360_v12 }
 0x14c   :  { %2599 = vmatpush1.bf16.msra.mxu0 %v3354_v10  ;;  %2631 = vmatpush1.bf16.msra.mxu1 %v3387_v25 }
 0x14d   :  { %2601 = vmatprep.subr.bf16.mxu0 %v3369_v15  ;;  %2633 = vmatprep.subr.bf16.mxu1 %v3396_v29 }
 0x150   :  { %2603 = vmatpush1.bf16.msra.mxu0 %v3390_v27  ;;  %2635 = vmatpush1.bf16.msra.mxu1 %v3423_v42 }
 0x151   :  { %2605 = vmatprep.subr.bf16.mxu0 %v3405_v34  ;;  %2637 = vmatprep.subr.bf16.mxu1 %v3429_v45 }
 0x154   :  { %2607 = vmatpush1.bf16.msra.mxu0 %v3426_v43  ;;  %2639 = vmatpush1.bf16.msra.mxu1 %v3464_v62 }
 0x155   :  { %2641 = vmatprep.subr.bf16.mxu0 %v3438_v50  ;;  %2649 = vmatprep.subr.bf16.mxu1 %v3485_v13 }
 0x20a   :  { %v662_v18 = vpop.f32.mrb[2].mxu0  ;;  %v733_v28 = vpop.f32.mrb[2].mxu1 }
 0x20b   :  { %v738_v33 = vadd.f32 %v662_v18, %v3563_v47  ;;  %v664_v35 = vpop.f32.mrb[3].mxu0  ;;  %v735_v39 = vpop.f32.mrb[3].mxu1  ;;  %v740_v37 = vadd.f32 %v733_v28, %v3572_v24 }
 0x20c   :  { %v739_v41 = vadd.f32 %v664_v35, %v3565_v49  ;;  %v741_v54 = vadd.f32 %v735_v39, %v3569_v5 }
 0x20d   :  { %v2377_v52 = vmul.f32 -1.442695, %v738_v33 }
 0x20e   :  { %v2378_v53 = vmul.f32 -1.442695, %v739_v41  ;;  %v2379_v55 = vmul.f32 -1.442695, %v741_v54 }
 0x20f   :  { %3021 = vpow2.f32 %v2377_v52 }
 0x210   :  { %3023 = vpow2.f32 %v2378_v53 }
 0x211   :  { %3025 = vpow2.f32 %v2379_v55 }
 0x212   :  { %3027 = vtanh.f32 %v740_v37 }
 0x219   :  { %v3022_v56 = vpop.eup %3021 }
 0x21a   :  { %v3024_v59 = vpop.eup %3023  ;;  %v745_v40 = vadd.f32 1.0, %v3022_v56 }
 0x21b   :  { %v751_v1 = vadd.f32 1.0, %v3024_v59  ;;  %v3026_v11 = vpop.eup %3025 }
 0x21c   :  { %3029 = vrcp.f32 %v745_v40  ;;  %v3028_v14 = vpop.eup %3027  ;;  %v758_v35 = vadd.f32 1.0, %v3026_v11 }
 0x21d   :  { %3031 = vrcp.f32 %v751_v1 }
 0x21e   :  { %3033 = vrcp.f32 %v758_v35 }
 0x226   :  { %v3030_v61 = vpop.eup %3029 }
 0x227   :  { %v3032_v18 = vpop.eup %3031  ;;  %v762_v33 = vmul.f32 %v3030_v61, %v3028_v14 }
 0x228   :  { %v761_v41 = vmul.f32 %v3032_v18, %v3576_v2  ;;  %v3034_v28 = vpop.eup %3033  ;;  %v2381_v2 = vld [vmem:[%s3902_s0 + $0x10] sm:$0xff] }
 0x22a   :  { %v3636_v39 = vadd.f32 %v762_v33, %v761_v41 }
 0x22c   :  { %3035 = vtanh.f32 %v3636_v39 }
 0x236   :  { %v3036_v52 = vpop.eup %3035 }
 0x237   :  { %v765_v53 = vmul.f32 %v3036_v52, %v3034_v28 }
 0x239   :  { %2380 = vst [vmem:[%s3904_s5 + $0x8] sm:$0xff] %v765_v53  ;;  %835 = vmatmul.mubr.f32.vlgmr.msra.gmra.mrb[4].mxu0 %v765_v53  ;;  %906 = vmatmul.mubr.f32.vlgmr.msra.gmra.mrb[4].mxu1 %v765_v53 }
 0x23a   :  { %2643 = vmatpush1.bf16.msra.mxu0 %v3467_v0  ;;  %2651 = vmatpush1.bf16.msra.mxu1 %v3495_v19 }
 0x23b   :  { %2645 = vmatprep.subr.bf16.mxu0 %v3480_v6  ;;  %2653 = vmatprep.subr.bf16.mxu1 %v3501_v23 }
 0x23c   :  { %979 = vmatprep.mubr.f32.mxu0 %v3117_v3  ;;  %1050 = vmatprep.mubr.f32.mxu1 %v3117_v3 }
 0x23e   :  { %2647 = vmatpush1.bf16.msra.mxu0 %v3498_v20  ;;  %2655 = vmatpush1.bf16.msra.mxu1 %v3513_v30 }
 0x23f   :  { %2657 = vmatprep.subr.bf16.mxu0 %v3159_v4  ;;  %2689 = vmatprep.subr.bf16.mxu1 %v3196_v17 }
 0x241   :  { %2382 = vmatmul.mubr.msk.f32.vlgmr.msra.gmra.mrb[4].mxu0 %vm274_vm0, %v2381_v2  ;;  %2383 = vmatmul.mubr.msk.f32.vlgmr.msra.gmra.mrb[4].mxu1 %vm274_vm0, %v2381_v2 }
 0x242   :  { %2659 = vmatpush1.bf16.msra.mxu0 %v3170_v8  ;;  %2691 = vmatpush1.bf16.msra.mxu1 %v3210_v22 }
 0x243   :  { %2661 = vmatprep.subr.bf16.mxu0 %v3172_v9  ;;  %2693 = vmatprep.subr.bf16.mxu1 %v3222_v26 }
 0x244   :  { %1153 = vmatprep.mubr.f32.mxu0 %v3117_v3  ;;  %1224 = vmatprep.mubr.f32.mxu1 %v3117_v3 }
 0x246   :  { %2663 = vmatpush1.bf16.msra.mxu0 %v3194_v16  ;;  %2695 = vmatpush1.bf16.msra.mxu1 %v3241_v32 }
 0x247   :  { %2665 = vmatprep.subr.bf16.mxu0 %v3208_v21  ;;  %2697 = vmatprep.subr.bf16.mxu1 %v3258_v38 }
 0x24a   :  { %2667 = vmatpush1.bf16.msra.mxu0 %v3238_v31  ;;  %2699 = vmatpush1.bf16.msra.mxu1 %v3276_v44 }
 0x24b   :  { %2669 = vmatprep.subr.bf16.mxu0 %v3253_v36  ;;  %2701 = vmatprep.subr.bf16.mxu1 %v3288_v48 }
 0x24e   :  { %2671 = vmatpush1.bf16.msra.mxu0 %v3282_v46  ;;  %2703 = vmatpush1.bf16.msra.mxu1 %v3315_v57 }
 0x24f   :  { %2673 = vmatprep.subr.bf16.mxu0 %v3297_v51  ;;  %2705 = vmatprep.subr.bf16.mxu1 %v3324_v60 }
 0x252   :  { %2675 = vmatpush1.bf16.msra.mxu0 %v3318_v58  ;;  %2707 = vmatpush1.bf16.msra.mxu1 %v3351_v7 }
 0x253   :  { %2677 = vmatprep.subr.bf16.mxu0 %v3333_v63  ;;  %2709 = vmatprep.subr.bf16.mxu1 %v3360_v12 }
 0x256   :  { %2679 = vmatpush1.bf16.msra.mxu0 %v3354_v10  ;;  %2711 = vmatpush1.bf16.msra.mxu1 %v3387_v25 }
 0x257   :  { %2681 = vmatprep.subr.bf16.mxu0 %v3369_v15  ;;  %2713 = vmatprep.subr.bf16.mxu1 %v3396_v29 }
 0x25a   :  { %2683 = vmatpush1.bf16.msra.mxu0 %v3390_v27  ;;  %2715 = vmatpush1.bf16.msra.mxu1 %v3423_v42 }
 0x25b   :  { %2685 = vmatprep.subr.bf16.mxu0 %v3405_v34  ;;  %2717 = vmatprep.subr.bf16.mxu1 %v3429_v45 }
 0x25e   :  { %2687 = vmatpush1.bf16.msra.mxu0 %v3426_v43  ;;  %2719 = vmatpush1.bf16.msra.mxu1 %v3464_v62 }
 0x25f   :  { %2721 = vmatprep.subr.bf16.mxu0 %v3438_v50  ;;  %2729 = vmatprep.subr.bf16.mxu1 %v3485_v13 }
 0x314   :  { %v981_v54 = vpop.f32.mrb[4].mxu0  ;;  %v1052_v55 = vpop.f32.mrb[4].mxu1 }
 0x315   :  { %v1057_v37 = vadd.f32 %v981_v54, %v3563_v47  ;;  %v983_v56 = vpop.f32.mrb[5].mxu0  ;;  %v1054_v59 = vpop.f32.mrb[5].mxu1  ;;  %v1059_v18 = vadd.f32 %v1052_v55, %v3572_v24 }
 0x316   :  { %v1058_v40 = vadd.f32 %v983_v56, %v3565_v49  ;;  %v1060_v14 = vadd.f32 %v1054_v59, %v3569_v5 }
 0x317   :  { %v2384_v1 = vmul.f32 -1.442695, %v1057_v37 }
 0x318   :  { %v2385_v11 = vmul.f32 -1.442695, %v1058_v40  ;;  %v2386_v61 = vmul.f32 -1.442695, %v1060_v14 }
 0x319   :  { %3037 = vpow2.f32 %v2384_v1 }
 0x31a   :  { %3039 = vpow2.f32 %v2385_v11 }
 0x31b   :  { %3041 = vpow2.f32 %v2386_v61 }
 0x31c   :  { %3043 = vtanh.f32 %v1059_v18 }
 0x323   :  { %v3038_v33 = vpop.eup %3037 }
 0x324   :  { %v3040_v35 = vpop.eup %3039  ;;  %v1064_v41 = vadd.f32 1.0, %v3038_v33 }
 0x325   :  { %v1070_v28 = vadd.f32 1.0, %v3040_v35  ;;  %v3042_v52 = vpop.eup %3041 }
 0x326   :  { %3045 = vrcp.f32 %v1064_v41  ;;  %v3044_v53 = vpop.eup %3043  ;;  %v1077_v56 = vadd.f32 1.0, %v3042_v52 }
 0x327   :  { %3047 = vrcp.f32 %v1070_v28 }
 0x328   :  { %3049 = vrcp.f32 %v1077_v56 }
 0x330   :  { %v3046_v2 = vpop.eup %3045 }
 0x331   :  { %v3048_v54 = vpop.eup %3047  ;;  %v1081_v37 = vmul.f32 %v3046_v2, %v3044_v53 }
 0x332   :  { %v1080_v40 = vmul.f32 %v3048_v54, %v3636_v39  ;;  %v3050_v55 = vpop.eup %3049  ;;  %v2388_v39 = vld [vmem:[%s3902_s0 + $0x18] sm:$0xff] }
 0x334   :  { %v3696_v59 = vadd.f32 %v1081_v37, %v1080_v40 }
 0x336   :  { %3051 = vtanh.f32 %v3696_v59 }
 0x340   :  { %v3052_v1 = vpop.eup %3051 }
 0x341   :  { %v1084_v11 = vmul.f32 %v3052_v1, %v3050_v55 }
 0x343   :  { %2387 = vst [vmem:[%s3904_s5 + $0x10] sm:$0xff] %v1084_v11  ;;  %1154 = vmatmul.mubr.f32.vlgmr.msra.gmra.mrb[6].mxu0 %v1084_v11  ;;  %1225 = vmatmul.mubr.f32.vlgmr.msra.gmra.mrb[6].mxu1 %v1084_v11 }
 0x344   :  { %2723 = vmatpush1.bf16.msra.mxu0 %v3467_v0  ;;  %2731 = vmatpush1.bf16.msra.mxu1 %v3495_v19 }
 0x345   :  { %2725 = vmatprep.subr.bf16.mxu0 %v3480_v6  ;;  %2733 = vmatprep.subr.bf16.mxu1 %v3501_v23 }
 0x346   :  { %1298 = vmatprep.mubr.f32.mxu0 %v3117_v3  ;;  %1369 = vmatprep.mubr.f32.mxu1 %v3117_v3 }
 0x348   :  { %2727 = vmatpush1.bf16.msra.mxu0 %v3498_v20  ;;  %2735 = vmatpush1.bf16.msra.mxu1 %v3513_v30 }
 0x349   :  { %2737 = vmatprep.subr.bf16.mxu0 %v3159_v4  ;;  %2769 = vmatprep.subr.bf16.mxu1 %v3196_v17 }
 0x34b   :  { %2389 = vmatmul.mubr.msk.f32.vlgmr.msra.gmra.mrb[6].mxu0 %vm274_vm0, %v2388_v39  ;;  %2390 = vmatmul.mubr.msk.f32.vlgmr.msra.gmra.mrb[6].mxu1 %vm274_vm0, %v2388_v39 }
 0x34c   :  { %2739 = vmatpush1.bf16.msra.mxu0 %v3170_v8  ;;  %2771 = vmatpush1.bf16.msra.mxu1 %v3210_v22 }
 0x34d   :  { %2741 = vmatprep.subr.bf16.mxu0 %v3172_v9  ;;  %2773 = vmatprep.subr.bf16.mxu1 %v3222_v26 }
 0x34e   :  { %1472 = vmatprep.mubr.f32.mxu0 %v3117_v3  ;;  %1543 = vmatprep.mubr.f32.mxu1 %v3117_v3 }
 0x350   :  { %2743 = vmatpush1.bf16.msra.mxu0 %v3194_v16  ;;  %2775 = vmatpush1.bf16.msra.mxu1 %v3241_v32 }
 0x351   :  { %2745 = vmatprep.subr.bf16.mxu0 %v3208_v21  ;;  %2777 = vmatprep.subr.bf16.mxu1 %v3258_v38 }
 0x354   :  { %2747 = vmatpush1.bf16.msra.mxu0 %v3238_v31  ;;  %2779 = vmatpush1.bf16.msra.mxu1 %v3276_v44 }
 0x355   :  { %2749 = vmatprep.subr.bf16.mxu0 %v3253_v36  ;;  %2781 = vmatprep.subr.bf16.mxu1 %v3288_v48 }
 0x358   :  { %2751 = vmatpush1.bf16.msra.mxu0 %v3282_v46  ;;  %2783 = vmatpush1.bf16.msra.mxu1 %v3315_v57 }
 0x359   :  { %2753 = vmatprep.subr.bf16.mxu0 %v3297_v51  ;;  %2785 = vmatprep.subr.bf16.mxu1 %v3324_v60 }
 0x35c   :  { %2755 = vmatpush1.bf16.msra.mxu0 %v3318_v58  ;;  %2787 = vmatpush1.bf16.msra.mxu1 %v3351_v7 }
 0x35d   :  { %2757 = vmatprep.subr.bf16.mxu0 %v3333_v63  ;;  %2789 = vmatprep.subr.bf16.mxu1 %v3360_v12 }
 0x360   :  { %2759 = vmatpush1.bf16.msra.mxu0 %v3354_v10  ;;  %2791 = vmatpush1.bf16.msra.mxu1 %v3387_v25 }
 0x361   :  { %2761 = vmatprep.subr.bf16.mxu0 %v3369_v15  ;;  %2793 = vmatprep.subr.bf16.mxu1 %v3396_v29 }
 0x364   :  { %2763 = vmatpush1.bf16.msra.mxu0 %v3390_v27  ;;  %2795 = vmatpush1.bf16.msra.mxu1 %v3423_v42 }
 0x365   :  { %2765 = vmatprep.subr.bf16.mxu0 %v3405_v34  ;;  %2797 = vmatprep.subr.bf16.mxu1 %v3429_v45 }
 0x368   :  { %2767 = vmatpush1.bf16.msra.mxu0 %v3426_v43  ;;  %2799 = vmatpush1.bf16.msra.mxu1 %v3464_v62 }
 0x369   :  { %2801 = vmatprep.subr.bf16.mxu0 %v3438_v50  ;;  %2809 = vmatprep.subr.bf16.mxu1 %v3485_v13 }
 0x41e   :  { %v1300_v14 = vpop.f32.mrb[6].mxu0  ;;  %v1371_v61 = vpop.f32.mrb[6].mxu1 }
 0x41f   :  { %v1376_v18 = vadd.f32 %v1300_v14, %v3563_v47  ;;  %v1302_v33 = vpop.f32.mrb[7].mxu0  ;;  %v1373_v35 = vpop.f32.mrb[7].mxu1  ;;  %v1378_v54 = vadd.f32 %v1371_v61, %v3572_v24 }
 0x420   :  { %v1377_v41 = vadd.f32 %v1302_v33, %v3565_v49  ;;  %v1379_v53 = vadd.f32 %v1373_v35, %v3569_v5 }
 0x421   :  { %v2391_v28 = vmul.f32 -1.442695, %v1376_v18 }
 0x422   :  { %v2392_v52 = vmul.f32 -1.442695, %v1377_v41  ;;  %v2393_v2 = vmul.f32 -1.442695, %v1379_v53 }
 0x423   :  { %3053 = vpow2.f32 %v2391_v28 }
 0x424   :  { %3055 = vpow2.f32 %v2392_v52 }
 0x425   :  { %3057 = vpow2.f32 %v2393_v2 }
 0x426   :  { %3059 = vtanh.f32 %v1378_v54 }
 0x42d   :  { %v3054_v37 = vpop.eup %3053 }
 0x42e   :  { %v3056_v56 = vpop.eup %3055  ;;  %v1383_v40 = vadd.f32 1.0, %v3054_v37 }
 0x42f   :  { %v1389_v55 = vadd.f32 1.0, %v3056_v56  ;;  %v3058_v1 = vpop.eup %3057 }
 0x430   :  { %3061 = vrcp.f32 %v1383_v40  ;;  %v3060_v11 = vpop.eup %3059  ;;  %v1396_v33 = vadd.f32 1.0, %v3058_v1 }
 0x431   :  { %3063 = vrcp.f32 %v1389_v55 }
 0x432   :  { %3065 = vrcp.f32 %v1396_v33 }
 0x43a   :  { %v3062_v39 = vpop.eup %3061 }
 0x43b   :  { %v3064_v14 = vpop.eup %3063  ;;  %v1400_v18 = vmul.f32 %v3062_v39, %v3060_v11 }
 0x43c   :  { %v1399_v41 = vmul.f32 %v3064_v14, %v3696_v59  ;;  %v3066_v61 = vpop.eup %3065  ;;  %v2395_v59 = vld [vmem:[%s3902_s0 + $0x20] sm:$0xff] }
 0x43e   :  { %v3756_v35 = vadd.f32 %v1400_v18, %v1399_v41 }
 0x440   :  { %3067 = vtanh.f32 %v3756_v35 }
 0x44a   :  { %v3068_v28 = vpop.eup %3067 }
 0x44b   :  { %v1403_v52 = vmul.f32 %v3068_v28, %v3066_v61 }
 0x44d   :  { %2394 = vst [vmem:[%s3904_s5 + $0x18] sm:$0xff] %v1403_v52  ;;  %1473 = vmatmul.mubr.f32.vlgmr.msra.gmra.mrb[8].mxu0 %v1403_v52  ;;  %1544 = vmatmul.mubr.f32.vlgmr.msra.gmra.mrb[8].mxu1 %v1403_v52 }
 0x44e   :  { %2803 = vmatpush1.bf16.msra.mxu0 %v3467_v0  ;;  %2811 = vmatpush1.bf16.msra.mxu1 %v3495_v19 }
 0x44f   :  { %2805 = vmatprep.subr.bf16.mxu0 %v3480_v6  ;;  %2813 = vmatprep.subr.bf16.mxu1 %v3501_v23 }
 0x450   :  { %1617 = vmatprep.mubr.f32.mxu0 %v3117_v3  ;;  %1688 = vmatprep.mubr.f32.mxu1 %v3117_v3 }
 0x452   :  { %2807 = vmatpush1.bf16.msra.mxu0 %v3498_v20  ;;  %2815 = vmatpush1.bf16.msra.mxu1 %v3513_v30 }
 0x453   :  { %2817 = vmatprep.subr.bf16.mxu0 %v3159_v4  ;;  %2849 = vmatprep.subr.bf16.mxu1 %v3196_v17 }
 0x455   :  { %2396 = vmatmul.mubr.msk.f32.vlgmr.msra.gmra.mrb[8].mxu0 %vm274_vm0, %v2395_v59  ;;  %2397 = vmatmul.mubr.msk.f32.vlgmr.msra.gmra.mrb[8].mxu1 %vm274_vm0, %v2395_v59 }
 0x456   :  { %2819 = vmatpush1.bf16.msra.mxu0 %v3170_v8  ;;  %2851 = vmatpush1.bf16.msra.mxu1 %v3210_v22 }
 0x457   :  { %2821 = vmatprep.subr.bf16.mxu0 %v3172_v9  ;;  %2853 = vmatprep.subr.bf16.mxu1 %v3222_v26 }
 0x458   :  { %1791 = vmatprep.mubr.f32.mxu0 %v3117_v3  ;;  %1862 = vmatprep.mubr.f32.mxu1 %v3117_v3 }
 0x45a   :  { %2823 = vmatpush1.bf16.msra.mxu0 %v3194_v16  ;;  %2855 = vmatpush1.bf16.msra.mxu1 %v3241_v32 }
 0x45b   :  { %2825 = vmatprep.subr.bf16.mxu0 %v3208_v21  ;;  %2857 = vmatprep.subr.bf16.mxu1 %v3258_v38 }
 0x45e   :  { %2827 = vmatpush1.bf16.msra.mxu0 %v3238_v31  ;;  %2859 = vmatpush1.bf16.msra.mxu1 %v3276_v44 }
 0x45f   :  { %2829 = vmatprep.subr.bf16.mxu0 %v3253_v36  ;;  %2861 = vmatprep.subr.bf16.mxu1 %v3288_v48 }
 0x462   :  { %2831 = vmatpush1.bf16.msra.mxu0 %v3282_v46  ;;  %2863 = vmatpush1.bf16.msra.mxu1 %v3315_v57 }
 0x463   :  { %2833 = vmatprep.subr.bf16.mxu0 %v3297_v51  ;;  %2865 = vmatprep.subr.bf16.mxu1 %v3324_v60 }
 0x466   :  { %2835 = vmatpush1.bf16.msra.mxu0 %v3318_v58  ;;  %2867 = vmatpush1.bf16.msra.mxu1 %v3351_v7 }
 0x467   :  { %2837 = vmatprep.subr.bf16.mxu0 %v3333_v63  ;;  %2869 = vmatprep.subr.bf16.mxu1 %v3360_v12 }
 0x46a   :  { %2839 = vmatpush1.bf16.msra.mxu0 %v3354_v10  ;;  %2871 = vmatpush1.bf16.msra.mxu1 %v3387_v25 }
 0x46b   :  { %2841 = vmatprep.subr.bf16.mxu0 %v3369_v15  ;;  %2873 = vmatprep.subr.bf16.mxu1 %v3396_v29 }
 0x46e   :  { %2843 = vmatpush1.bf16.msra.mxu0 %v3390_v27  ;;  %2875 = vmatpush1.bf16.msra.mxu1 %v3423_v42 }
 0x46f   :  { %2845 = vmatprep.subr.bf16.mxu0 %v3405_v34  ;;  %2877 = vmatprep.subr.bf16.mxu1 %v3429_v45 }
 0x472   :  { %2847 = vmatpush1.bf16.msra.mxu0 %v3426_v43  ;;  %2879 = vmatpush1.bf16.msra.mxu1 %v3464_v62 }
 0x473   :  { %2881 = vmatprep.subr.bf16.mxu0 %v3438_v50  ;;  %2889 = vmatprep.subr.bf16.mxu1 %v3485_v13 }
 0x528   :  { %v1619_v53 = vpop.f32.mrb[8].mxu0  ;;  %v1690_v2 = vpop.f32.mrb[8].mxu1 }
 0x529   :  { %v1695_v54 = vadd.f32 %v1619_v53, %v3563_v47  ;;  %v1621_v37 = vpop.f32.mrb[9].mxu0  ;;  %v1692_v56 = vpop.f32.mrb[9].mxu1  ;;  %v1697_v14 = vadd.f32 %v1690_v2, %v3572_v24 }
 0x52a   :  { %v1696_v40 = vadd.f32 %v1621_v37, %v3565_v49  ;;  %v1698_v11 = vadd.f32 %v1692_v56, %v3569_v5 }
 0x52b   :  { %v2398_v55 = vmul.f32 -1.442695, %v1695_v54 }
 0x52c   :  { %v2399_v1 = vmul.f32 -1.442695, %v1696_v40  ;;  %v2400_v39 = vmul.f32 -1.442695, %v1698_v11 }
 0x52d   :  { %3069 = vpow2.f32 %v2398_v55 }
 0x52e   :  { %3071 = vpow2.f32 %v2399_v1 }
 0x52f   :  { %3073 = vpow2.f32 %v2400_v39 }
 0x530   :  { %3075 = vtanh.f32 %v1697_v14 }
 0x537   :  { %v3070_v18 = vpop.eup %3069 }
 0x538   :  { %v3072_v33 = vpop.eup %3071  ;;  %v1702_v41 = vadd.f32 1.0, %v3070_v18 }
 0x539   :  { %v1708_v61 = vadd.f32 1.0, %v3072_v33  ;;  %v3074_v28 = vpop.eup %3073 }
 0x53a   :  { %3077 = vrcp.f32 %v1702_v41  ;;  %v3076_v52 = vpop.eup %3075  ;;  %v1715_v37 = vadd.f32 1.0, %v3074_v28 }
 0x53b   :  { %3079 = vrcp.f32 %v1708_v61 }
 0x53c   :  { %3081 = vrcp.f32 %v1715_v37 }
 0x544   :  { %v3078_v59 = vpop.eup %3077 }
 0x545   :  { %v3080_v53 = vpop.eup %3079  ;;  %v1719_v54 = vmul.f32 %v3078_v59, %v3076_v52 }
 0x546   :  { %v1718_v40 = vmul.f32 %v3080_v53, %v3756_v35  ;;  %v3082_v2 = vpop.eup %3081  ;;  %v2402_v35 = vld [vmem:[%s3902_s0 + $0x28] sm:$0xff] }
 0x548   :  { %v3816_v56 = vadd.f32 %v1719_v54, %v1718_v40 }
 0x54a   :  { %3083 = vtanh.f32 %v3816_v56 }
 0x554   :  { %v3084_v55 = vpop.eup %3083 }
 0x555   :  { %v1722_v1 = vmul.f32 %v3084_v55, %v3082_v2 }
 0x557   :  { %2401 = vst [vmem:[%s3904_s5 + $0x20] sm:$0xff] %v1722_v1  ;;  %1792 = vmatmul.mubr.f32.vlgmr.msra.gmra.mrb[10].mxu0 %v1722_v1  ;;  %1863 = vmatmul.mubr.f32.vlgmr.msra.gmra.mrb[10].mxu1 %v1722_v1 }
 0x558   :  { %2883 = vmatpush1.bf16.msra.mxu0 %v3467_v0  ;;  %2891 = vmatpush1.bf16.msra.mxu1 %v3495_v19 }
 0x559   :  { %2885 = vmatprep.subr.bf16.mxu0 %v3480_v6  ;;  %2893 = vmatprep.subr.bf16.mxu1 %v3501_v23 }
 0x55a   :  { %1936 = vmatprep.mubr.f32.mxu0 %v3117_v3  ;;  %2007 = vmatprep.mubr.f32.mxu1 %v3117_v3 }
 0x55c   :  { %2887 = vmatpush1.bf16.msra.mxu0 %v3498_v20  ;;  %2895 = vmatpush1.bf16.msra.mxu1 %v3513_v30 }
 0x55d   :  { %2897 = vmatprep.subr.bf16.mxu0 %v3159_v4  ;;  %2929 = vmatprep.subr.bf16.mxu1 %v3196_v17 }
 0x55f   :  { %2403 = vmatmul.mubr.msk.f32.vlgmr.msra.gmra.mrb[10].mxu0 %vm274_vm0, %v2402_v35  ;;  %2404 = vmatmul.mubr.msk.f32.vlgmr.msra.gmra.mrb[10].mxu1 %vm274_vm0, %v2402_v35 }
 0x560   :  { %2899 = vmatpush1.bf16.msra.mxu0 %v3170_v8  ;;  %2931 = vmatpush1.bf16.msra.mxu1 %v3210_v22 }
 0x561   :  { %2901 = vmatprep.subr.bf16.mxu0 %v3172_v9  ;;  %2933 = vmatprep.subr.bf16.mxu1 %v3222_v26 }
 0x562   :  { %2110 = vmatprep.mubr.f32.mxu0 %v3117_v3  ;;  %2181 = vmatprep.mubr.f32.mxu1 %v3117_v3 }
 0x564   :  { %2903 = vmatpush1.bf16.msra.mxu0 %v3194_v16  ;;  %2935 = vmatpush1.bf16.msra.mxu1 %v3241_v32 }
 0x565   :  { %2905 = vmatprep.subr.bf16.mxu0 %v3208_v21  ;;  %2937 = vmatprep.subr.bf16.mxu1 %v3258_v38 }
 0x568   :  { %2907 = vmatpush1.bf16.msra.mxu0 %v3238_v31  ;;  %2939 = vmatpush1.bf16.msra.mxu1 %v3276_v44 }
 0x569   :  { %2909 = vmatprep.subr.bf16.mxu0 %v3253_v36  ;;  %2941 = vmatprep.subr.bf16.mxu1 %v3288_v48 }
 0x56c   :  { %2911 = vmatpush1.bf16.msra.mxu0 %v3282_v46  ;;  %2943 = vmatpush1.bf16.msra.mxu1 %v3315_v57 }
 0x56d   :  { %2913 = vmatprep.subr.bf16.mxu0 %v3297_v51  ;;  %2945 = vmatprep.subr.bf16.mxu1 %v3324_v60 }
 0x570   :  { %2915 = vmatpush1.bf16.msra.mxu0 %v3318_v58  ;;  %2947 = vmatpush1.bf16.msra.mxu1 %v3351_v7 }
 0x571   :  { %2917 = vmatprep.subr.bf16.mxu0 %v3333_v63  ;;  %2949 = vmatprep.subr.bf16.mxu1 %v3360_v12 }
 0x574   :  { %2919 = vmatpush1.bf16.msra.mxu0 %v3354_v10  ;;  %2951 = vmatpush1.bf16.msra.mxu1 %v3387_v25 }
 0x575   :  { %2921 = vmatprep.subr.bf16.mxu0 %v3369_v15  ;;  %2953 = vmatprep.subr.bf16.mxu1 %v3396_v29  ;;  %v2409_v29 = vld [vmem:[%s3902_s0 + $0x30] sm:$0xff] }
 0x578   :  { %2923 = vmatpush1.bf16.msra.mxu0 %v3390_v27  ;;  %2955 = vmatpush1.bf16.msra.mxu1 %v3423_v42 }
 0x579   :  { %2925 = vmatprep.subr.bf16.mxu0 %v3405_v34  ;;  %2957 = vmatprep.subr.bf16.mxu1 %v3429_v45 }
 0x57c   :  { %2927 = vmatpush1.bf16.msra.mxu0 %v3426_v43  ;;  %2959 = vmatpush1.bf16.msra.mxu1 %v3464_v62 }
 0x57d   :  { %2961 = vmatprep.subr.bf16.mxu0 %v3438_v50  ;;  %2969 = vmatprep.subr.bf16.mxu1 %v3485_v13 }
 0x632   :  { %v1938_v4 = vpop.f32.mrb[10].mxu0  ;;  %v2009_v8 = vpop.f32.mrb[10].mxu1 }
 0x633   :  { %v2014_v9 = vadd.f32 %v1938_v4, %v3563_v47  ;;  %v1940_v16 = vpop.f32.mrb[11].mxu0  ;;  %v2011_v17 = vpop.f32.mrb[11].mxu1  ;;  %v2016_v36 = vadd.f32 %v2009_v8, %v3572_v24 }
 0x634   :  { %v2015_v21 = vadd.f32 %v1940_v16, %v3565_v49  ;;  %v2017_v31 = vadd.f32 %v2011_v17, %v3569_v5 }
 0x635   :  { %v2405_v22 = vmul.f32 -1.442695, %v2014_v9 }
 0x636   :  { %v2406_v26 = vmul.f32 -1.442695, %v2015_v21  ;;  %v2407_v32 = vmul.f32 -1.442695, %v2017_v31 }
 0x637   :  { %3085 = vpow2.f32 %v2405_v22 }
 0x638   :  { %3087 = vpow2.f32 %v2406_v26 }
 0x639   :  { %3089 = vpow2.f32 %v2407_v32 }
 0x63a   :  { %3091 = vtanh.f32 %v2016_v36 }
 0x641   :  { %v3086_v38 = vpop.eup %3085 }
 0x642   :  { %v3088_v44 = vpop.eup %3087  ;;  %v2021_v46 = vadd.f32 1.0, %v3086_v38 }
 0x643   :  { %v2027_v48 = vadd.f32 1.0, %v3088_v44  ;;  %v3090_v51 = vpop.eup %3089 }
 0x644   :  { %3093 = vrcp.f32 %v2021_v46  ;;  %v3092_v57 = vpop.eup %3091  ;;  %v2034_v7 = vadd.f32 1.0, %v3090_v51 }
 0x645   :  { %3095 = vrcp.f32 %v2027_v48 }
 0x646   :  { %3097 = vrcp.f32 %v2034_v7 }
 0x64e   :  { %v3094_v58 = vpop.eup %3093 }
 0x64f   :  { %v3096_v60 = vpop.eup %3095  ;;  %v2038_v63 = vmul.f32 %v3094_v58, %v3092_v57 }
 0x650   :  { %v2037_v10 = vmul.f32 %v3096_v60, %v3816_v56  ;;  %v3098_v15 = vpop.eup %3097 }
 0x652   :  { %v2039_v12 = vadd.f32 %v2038_v63, %v2037_v10 }
 0x654   :  { %3099 = vtanh.f32 %v2039_v12 }
 0x65e   :  { %v3100_v25 = vpop.eup %3099 }
 0x65f   :  { %v2041_v27 = vmul.f32 %v3100_v25, %v3098_v15 }
 0x661   :  { %2408 = vst [vmem:[%s3904_s5 + $0x28] sm:$0xff] %v2041_v27  ;;  %2111 = vmatmul.mubr.f32.vlgmr.msra.gmra.mrb[12].mxu0 %v2041_v27  ;;  %2182 = vmatmul.mubr.f32.vlgmr.msra.gmra.mrb[12].mxu1 %v2041_v27 }
 0x662   :  { %2963 = vmatpush1.bf16.msra.mxu0 %v3467_v0  ;;  %2971 = vmatpush1.bf16.msra.mxu1 %v3495_v19 }
 0x663   :  { %2965 = vmatprep.subr.bf16.mxu0 %v3480_v6  ;;  %2973 = vmatprep.subr.bf16.mxu1 %v3501_v23 }
 0x664   :  { %2255 = vmatprep.mubr.f32.mxu0 %v3117_v3  ;;  %2326 = vmatprep.mubr.f32.mxu1 %v3117_v3 }
 0x666   :  { %2967 = vmatpush1.bf16.msra.mxu0 %v3498_v20  ;;  %2975 = vmatpush1.bf16.msra.mxu1 %v3513_v30 }
 0x669   :  { %2410 = vmatmul.mubr.msk.f32.vlgmr.msra.gmra.mrb[12].mxu0 %vm274_vm0, %v2409_v29  ;;  %2411 = vmatmul.mubr.msk.f32.vlgmr.msra.gmra.mrb[12].mxu1 %vm274_vm0, %v2409_v29 }
 0x73c   :  { %v2257_v34 = vpop.f32.mrb[12].mxu0  ;;  %v2328_v42 = vpop.f32.mrb[12].mxu1 }
 0x73d   :  { %v2333_v43 = vadd.f32 %v2257_v34, %v3563_v47  ;;  %v2259_v45 = vpop.f32.mrb[13].mxu0  ;;  %v2330_v50 = vpop.f32.mrb[13].mxu1  ;;  %v2335_v19 = vadd.f32 %v2328_v42, %v3572_v24 }
 0x73e   :  { %v2334_v3 = vadd.f32 %v2259_v45, %v3565_v49  ;;  %v2336_v6 = vadd.f32 %v2330_v50, %v3569_v5 }
 0x73f   :  { %v2412_v62 = vmul.f32 -1.442695, %v2333_v43 }
 0x740   :  { %v2413_v0 = vmul.f32 -1.442695, %v2334_v3  ;;  %v2414_v13 = vmul.f32 -1.442695, %v2336_v6 }
 0x741   :  { %3101 = vpow2.f32 %v2412_v62 }
 0x742   :  { %3103 = vpow2.f32 %v2413_v0 }
 0x743   :  { %3105 = vpow2.f32 %v2414_v13 }
 0x744   :  { %3107 = vtanh.f32 %v2335_v19 }
 0x74b   :  { %v3102_v20 = vpop.eup %3101 }
 0x74c   :  { %v3104_v23 = vpop.eup %3103  ;;  %v2340_v30 = vadd.f32 1.0, %v3102_v20 }
 0x74d   :  { %v2346_v11 = vadd.f32 1.0, %v3104_v23  ;;  %v3106_v47 = vpop.eup %3105 }
 0x74e   :  { %3109 = vrcp.f32 %v2340_v30  ;;  %v3108_v39 = vpop.eup %3107  ;;  %v2353_v33 = vadd.f32 1.0, %v3106_v47 }
 0x74f   :  { %3111 = vrcp.f32 %v2346_v11 }
 0x750   :  { %3113 = vrcp.f32 %v2353_v33 }
 0x758   :  { %v3110_v49 = vpop.eup %3109 }
 0x759   :  { %v3112_v14 = vpop.eup %3111  ;;  %v2357_v18 = vmul.f32 %v3110_v49, %v3108_v39 }
 0x75a   :  { %v2356_v41 = vmul.f32 %v3112_v14, %v2039_v12  ;;  %v3114_v5 = vpop.eup %3113 }
 0x75c   :  { %v2358_v61 = vadd.f32 %v2357_v18, %v2356_v41 }
 0x75e   :  { %3115 = vtanh.f32 %v2358_v61 }
 0x768   :  { %v3116_v24 = vpop.eup %3115 }
 0x769   :  { %v2360_v28 = vmul.f32 %v3116_v24, %v3114_v5 }
 0x76b   :  { %2415 = vst [vmem:[%s3904_s5 + $0x30] sm:$0xff] %v2360_v28 }

</bundles_post_ra>
